<compile_context>
chip_gen: v5e
topology: v5e:2x2
jax: 0.10.0
libtpu: 0.0.40
codegen_flags: <defaults>
</compile_context>

<pallas_src>
import math
import functools

import jax
import jax.numpy as jnp
from jax.experimental import pallas as pl
from jax.experimental.pallas import tpu as pltpu


def _erf_approx(x):
    """Abramowitz & Stegun 7.1.26 erf approximation, |err| <= 1.5e-7 (exp + VPU ops only)."""
    t = 1.0 / (1.0 + 0.3275911 * jnp.abs(x))
    poly = ((((1.061405429 * t - 1.453152027) * t + 1.421413741) * t
             - 0.284496736) * t + 0.254829592) * t
    y = 1.0 - poly * jnp.exp(-x * x)
    return jnp.where(x < 0.0, -y, y)


def _encoder_kernel(scale,
                    parts_ref, feats_ref, qpos_ref, kpos_ref,
                    p2d_ref, w_ref, out_ref):
    """One grid step == `bb` batch elements. Specialized to num_enc_heads == 1."""
    bb, n, c = parts_ref.shape
    l = feats_ref.shape[1]
    bn = bb * n
    bl = bb * l

    # Hoist all small params into vregs once (JAX does not CSE re-slices/broadcasts).
    p2d = p2d_ref[...]            # [13, C] f32: rows 0-4 LN w, 5-9 LN b, 10-12 biases
    lnw = p2d[0:5, :]
    lnb = p2d[5:10, :]
    b_proj = p2d[10:11, :]
    b_fc1 = p2d[11:12, :]
    b_fc2 = p2d[12:13, :]

    def ln(x, i):
        # PyTorch nn.LayerNorm: eps=1e-5, biased variance; two-pass stats for parity.
        mu = jnp.mean(x, axis=-1, keepdims=True)
        d = x - mu
        var = jnp.mean(d * d, axis=-1, keepdims=True)
        return d * jax.lax.rsqrt(var + 1e-5) * lnw[i:i + 1, :] + lnb[i:i + 1, :]

    def lin(x, j):
        # bf16 operands (MXU-native on v5e/v6e/v7x), f32 accumulation.
        # Weight loads stay just-in-time: each [C, C] weight is used exactly once.
        return jnp.dot(x.astype(jnp.bfloat16), w_ref[j],
                       preferred_element_type=jnp.float32)

    # Fold the batch sub-block into the matmul M dimension for all per-token work.
    parts = parts_ref[...].reshape(bn, c)
    feats = feats_ref[...].reshape(bl, c)
    qadd = parts + qpos_ref[...].reshape(bn, c)     # apply_pos(parts, qpos)
    kadd = feats + kpos_ref[...].reshape(bl, c)     # apply_pos(feats, kpos)

    # ---- AnyAttention (single head, qkv_bias=False), block-masked over batch ----
    # Attention scale folded into q before the to_q matmul (off the softmax path).
    q = lin(ln(qadd, 0) * scale, 0).astype(jnp.bfloat16)   # to_q(norm_q(.)) [bn, C]
    k = lin(ln(kadd, 1), 1).astype(jnp.bfloat16)           # to_k(norm_k(.)) [bl, C]
    v = lin(ln(feats, 2), 2).astype(jnp.bfloat16)          # to_v(norm_v(.)) [bl, C]

    # One MXU issue for all batches: q @ k^T contracting the channel dims.
    logits = jax.lax.dot_general(
        q, k, (((1,), (1,)), ((), ())),
        preferred_element_type=jnp.float32)                # [bn, bl] f32 (lane-dense)

    if bb > 1:
        # Block-diagonal mask built from 2-D iotas (comparisons only; no vector div),
        # so queries of batch b only see keys of batch b.
        row = jax.lax.broadcasted_iota(jnp.int32, (bn, bl), 0)
        col = jax.lax.broadcasted_iota(jnp.int32, (bn, bl), 1)
        same = None
        for b in range(bb):                                 # static, bb is tiny
            m = ((row >= b * n) & (row < (b + 1) * n)
                 & (col >= b * l) & (col < (b + 1) * l))
            same = m if same is None else (same | m)
        logits = jnp.where(same, logits, -1e9)              # exp() underflows to 0

    logits = logits - jnp.max(logits, axis=-1, keepdims=True)
    p = jnp.exp(logits)
    p = p * pl.reciprocal(jnp.sum(p, axis=-1, keepdims=True), approx=True)
    ctx = jnp.dot(p.astype(jnp.bfloat16), v,
                  preferred_element_type=jnp.float32)       # [bn, C]

    attn_out = lin(ctx, 3) + b_proj                 # proj
    # DropPath is identity at inference time.
    x = parts + attn_out

    # ---- SimpleReasoning: x + Conv1d_k1(LayerNorm(x))  (no bias) ----
    x = x + lin(ln(x, 3), 4)

    # ---- Mlp (hidden = dim): x + fc2(GELU(fc1(LayerNorm(x)))), exact-erf GELU ----
    h = lin(ln(x, 4), 5) + b_fc1
    h = 0.5 * h * (1.0 + _erf_approx(h * 0.7071067811865476))
    h = lin(h, 6) + b_fc2
    x = x + h

    out_ref[...] = x.reshape(bb, n, c)


def _tensorcores_per_chip():
    """2 only on v7x (2 TC/chip); v5e/v6e have 1. Conservative fallback = 1."""
    try:
        kind = jax.devices()[0].device_kind.lower()
        return 2 if "v7" in kind else 1
    except Exception:
        return 1


def encoder_forward(parts, feats, qpos, kpos, params, num_heads=1):
    assert num_heads == 1, "kernel is specialized to num_enc_heads == 1"
    B, N, C = parts.shape
    L = feats.shape[1]
    qpos2 = qpos.reshape(B, N, C)       # [B, N, 1, C] -> [B, N, C] (g == 1)
    p2d, w_stack = params
    w_bf16 = w_stack.astype(jnp.bfloat16)
    scale = (C / num_heads) ** (-0.5)

    # Grid policy (perf review): single step on single-TC chips (v5e/v6e) so one
    # step sees the full batch in the matmul M dim; 2-way "parallel" split only
    # when the chip actually has 2 TensorCores (v7x) AND each core gets >= 2
    # batch elements.  VMEM per step is ~(2L+3N)*C*4B*2buf + 16KiB params,
    # i.e. well under every generation's scoped VMEM limit at these sizes.
    nb = 2 if (_tensorcores_per_chip() == 2 and B >= 4 and B % 2 == 0) else 1
    bb = B // nb

    kernel = functools.partial(_encoder_kernel, scale)
    return pl.pallas_call(
        kernel,
        out_shape=jax.ShapeDtypeStruct((B, N, C), jnp.float32),
        grid_spec=pltpu.PrefetchScalarGridSpec(
            num_scalar_prefetch=0,
            grid=(nb,),
            in_specs=[
                pl.BlockSpec((bb, N, C), lambda i: (i, 0, 0)),   # parts
                pl.BlockSpec((bb, L, C), lambda i: (i, 0, 0)),   # feats
                pl.BlockSpec((bb, N, C), lambda i: (i, 0, 0)),   # qpos (squeezed)
                pl.BlockSpec((bb, L, C), lambda i: (i, 0, 0)),   # kpos
                pl.BlockSpec((13, C), lambda i: (0, 0)),         # LN w/b + linear biases
                pl.BlockSpec((7, C, C), lambda i: (0, 0, 0)),    # bf16 weights [in,out]
            ],
            out_specs=pl.BlockSpec((bb, N, C), lambda i: (i, 0, 0)),
        ),
        compiler_params=pltpu.CompilerParams(
            dimension_semantics=("parallel",)),
    )(parts, feats, qpos2, kpos, p2d, w_bf16)


def init_params(key, dim):
    """Deterministic PyTorch-style init (kaiming-uniform-ish linears, LN default)."""
    ks = jax.random.split(key, 10)
    bound = 1.0 / math.sqrt(dim)

    def linw(k):
        return jax.random.uniform(k, (dim, dim), jnp.float32, -bound, bound)

    def linb(k):
        return jax.random.uniform(k, (dim,), jnp.float32, -bound, bound)

    to_q, to_k, to_v, proj_w, conv_w, fc1_w, fc2_w = [linw(ks[i]) for i in range(7)]
    proj_b, fc1_b, fc2_b = [linb(ks[7 + i]) for i in range(3)]

    # Single [13, C] slab: rows 0-4 LN weights [norm_q,norm_k,norm_v,reason,mlp],
    # rows 5-9 LN biases, rows 10-12 biases [proj, fc1, fc2].
    lnw = jnp.ones((5, dim), jnp.float32)
    lnb = jnp.zeros((5, dim), jnp.float32)
    p2d = jnp.concatenate([lnw, lnb, jnp.stack([proj_b, fc1_b, fc2_b])], axis=0)
    # Linear/Conv weights (PyTorch stores [out, in]); pre-transpose to [in, out]:
    # [to_q, to_k, to_v, proj, reason.conv1d(k=1), fc1, fc2]
    w_stack = jnp.stack([w.T for w in (to_q, to_k, to_v, proj_w, conv_w, fc1_w, fc2_w)])
    return p2d, w_stack


def reference(parts, feats, qpos, kpos, params):
    """Plain-JAX f32 mirror of the PyTorch Encoder forward (mask=None, eval mode)."""
    p2d, W = params
    lnw, lnb, Bb = p2d[0:5], p2d[5:10], p2d[10:13]

    def ln(x, i):
        mu = jnp.mean(x, -1, keepdims=True)
        var = jnp.mean((x - mu) ** 2, -1, keepdims=True)
        return (x - mu) * jax.lax.rsqrt(var + 1e-5) * lnw[i] + lnb[i]

    B_, N, C = parts.shape
    qpos2 = qpos.reshape(B_, N, C)
    q = ln(parts + qpos2, 0) @ W[0]
    k = ln(feats + kpos, 1) @ W[1]
    v = ln(feats, 2) @ W[2]
    attn = jnp.einsum('bnc,blc->bnl', q, k) * (C ** -0.5)
    attn = jax.nn.softmax(attn, axis=-1)
    ctx = jnp.einsum('bnl,blc->bnc', attn, v)
    x = parts + (ctx @ W[3] + Bb[0])
    x = x + ln(x, 3) @ W[4]
    h = ln(x, 4) @ W[5] + Bb[1]
    h = jax.nn.gelu(h, approximate=False)   # PyTorch nn.GELU default (erf form)
    x = x + (h @ W[6] + Bb[2])
    return x


if __name__ == "__main__":
    # Encoder(dim=32, num_parts=8, num_enc_heads=1); feats seq = patch_num*patch_size = 64
    B, N, L, C = 2, 8, 64, 32
    key = jax.random.PRNGKey(0)
    k1, k2, k3, k4, kp = jax.random.split(key, 5)
    parts = jax.random.normal(k1, (B, N, C), jnp.float32)
    feats = jax.random.normal(k2, (B, L, C), jnp.float32)
    qpos = jax.random.normal(k3, (B, N, 1, C), jnp.float32)
    kpos = jax.random.normal(k4, (B, L, C), jnp.float32)
    params = init_params(kp, C)

    out = encoder_forward(parts, feats, qpos, kpos, params)
    out = jax.block_until_ready(out)

    ref = reference(parts, feats, qpos, kpos, params)
    err = float(jnp.max(jnp.abs(out - ref)))
    assert out.shape == (B, N, C)
    assert bool(jnp.all(jnp.isfinite(out)))
    # bf16 MXU operands vs. f32 reference: error stays ~1e-2 at these magnitudes.
    assert err < 5e-2, f"max abs err {err}"
    print("KERNEL_OK")
</pallas_src>

<mosaic_0001>
module attributes {stable_mosaic.version = 11 : i64} {
  func.func @_encoder_kernel(%arg0: i32, %arg1: memref<2x8x32xf32, #tpu.memory_space<vmem>>, %arg2: memref<2x64x32xf32, #tpu.memory_space<vmem>>, %arg3: memref<2x8x32xf32, #tpu.memory_space<vmem>>, %arg4: memref<2x64x32xf32, #tpu.memory_space<vmem>>, %arg5: memref<13x32xf32, #tpu.memory_space<vmem>>, %arg6: memref<7x32x32xbf16, #tpu.memory_space<vmem>>, %arg7: memref<2x8x32xf32, #tpu.memory_space<vmem>>) attributes {dimension_semantics = [#tpu.dimension_semantics<parallel>], iteration_bounds = array<i64: 1>, scalar_prefetch = 0 : i64, scratch_operands = 0 : i64, tpu.core_type = #tpu.core_type<tc>, window_params = [{transform_indices = @transform_0, window_bounds = array<i64: 2, 8, 32>}, {transform_indices = @transform_1, window_bounds = array<i64: 2, 64, 32>}, {transform_indices = @transform_2, window_bounds = array<i64: 2, 8, 32>}, {transform_indices = @transform_3, window_bounds = array<i64: 2, 64, 32>}, {pipeline_mode = #tpu.pipeline_mode<synchronous>, transform_indices = @transform_4, window_bounds = array<i64: 13, 32>}, {pipeline_mode = #tpu.pipeline_mode<synchronous>, transform_indices = @transform_5, window_bounds = array<i64: 7, 32, 32>}, {transform_indices = @transform_6, window_bounds = array<i64: 2, 8, 32>}]} {
    %c0 = arith.constant 0 : index
    %c0_0 = arith.constant 0 : index
    %0 = vector.load %arg5[%c0, %c0_0] : memref<13x32xf32, #tpu.memory_space<vmem>>, vector<13x32xf32>
    %1 = vector.extract_strided_slice %0 {offsets = [0, 0], sizes = [5, 32], strides = [1, 1]} : vector<13x32xf32> to vector<5x32xf32>
    %2 = vector.extract_strided_slice %0 {offsets = [5, 0], sizes = [5, 32], strides = [1, 1]} : vector<13x32xf32> to vector<5x32xf32>
    %3 = vector.extract_strided_slice %0 {offsets = [10, 0], sizes = [1, 32], strides = [1, 1]} : vector<13x32xf32> to vector<1x32xf32>
    %4 = vector.extract_strided_slice %0 {offsets = [11, 0], sizes = [1, 32], strides = [1, 1]} : vector<13x32xf32> to vector<1x32xf32>
    %5 = vector.extract_strided_slice %0 {offsets = [12, 0], sizes = [1, 32], strides = [1, 1]} : vector<13x32xf32> to vector<1x32xf32>
    %c0_1 = arith.constant 0 : index
    %c0_2 = arith.constant 0 : index
    %c0_3 = arith.constant 0 : index
    %6 = vector.load %arg1[%c0_1, %c0_2, %c0_3] : memref<2x8x32xf32, #tpu.memory_space<vmem>>, vector<2x8x32xf32>
    %7 = vector.shape_cast %6 : vector<2x8x32xf32> to vector<16x32xf32>
    %c0_4 = arith.constant 0 : index
    %c0_5 = arith.constant 0 : index
    %c0_6 = arith.constant 0 : index
    %8 = vector.load %arg2[%c0_4, %c0_5, %c0_6] : memref<2x64x32xf32, #tpu.memory_space<vmem>>, vector<2x64x32xf32>
    %9 = vector.shape_cast %8 : vector<2x64x32xf32> to vector<128x32xf32>
    %c0_7 = arith.constant 0 : index
    %c0_8 = arith.constant 0 : index
    %c0_9 = arith.constant 0 : index
    %10 = vector.load %arg3[%c0_7, %c0_8, %c0_9] : memref<2x8x32xf32, #tpu.memory_space<vmem>>, vector<2x8x32xf32>
    %11 = vector.shape_cast %10 : vector<2x8x32xf32> to vector<16x32xf32>
    %12 = arith.addf %7, %11 : vector<16x32xf32>
    %c0_10 = arith.constant 0 : index
    %c0_11 = arith.constant 0 : index
    %c0_12 = arith.constant 0 : index
    %13 = vector.load %arg4[%c0_10, %c0_11, %c0_12] : memref<2x64x32xf32, #tpu.memory_space<vmem>>, vector<2x64x32xf32>
    %14 = vector.shape_cast %13 : vector<2x64x32xf32> to vector<128x32xf32>
    %15 = arith.addf %9, %14 : vector<128x32xf32>
    %cst = arith.constant dense<0.000000e+00> : vector<16xf32>
    %16 = vector.multi_reduction <add>, %12, %cst [1] : vector<16x32xf32> to vector<16xf32>
    %17 = vector.shape_cast %16 : vector<16xf32> to vector<16x1xf32>
    %cst_13 = arith.constant 3.200000e+01 : f32
    %18 = vector.broadcast %cst_13 : f32 to vector<16x1xf32>
    %19 = arith.divf %17, %18 : vector<16x1xf32>
    %20 = vector.broadcast %19 : vector<16x1xf32> to vector<16x32xf32>
    %21 = arith.subf %12, %20 : vector<16x32xf32>
    %22 = arith.mulf %21, %21 : vector<16x32xf32>
    %cst_14 = arith.constant dense<0.000000e+00> : vector<16xf32>
    %23 = vector.multi_reduction <add>, %22, %cst_14 [1] : vector<16x32xf32> to vector<16xf32>
    %24 = vector.shape_cast %23 : vector<16xf32> to vector<16x1xf32>
    %cst_15 = arith.constant 3.200000e+01 : f32
    %25 = vector.broadcast %cst_15 : f32 to vector<16x1xf32>
    %26 = arith.divf %24, %25 : vector<16x1xf32>
    %cst_16 = arith.constant 9.99999974E-6 : f32
    %27 = vector.broadcast %cst_16 : f32 to vector<16x1xf32>
    %28 = arith.addf %26, %27 : vector<16x1xf32>
    %29 = math.rsqrt %28 : vector<16x1xf32>
    %30 = vector.broadcast %29 : vector<16x1xf32> to vector<16x32xf32>
    %31 = arith.mulf %21, %30 : vector<16x32xf32>
    %32 = vector.extract_strided_slice %1 {offsets = [0, 0], sizes = [1, 32], strides = [1, 1]} : vector<5x32xf32> to vector<1x32xf32>
    %33 = vector.broadcast %32 : vector<1x32xf32> to vector<16x32xf32>
    %34 = arith.mulf %31, %33 : vector<16x32xf32>
    %35 = vector.extract_strided_slice %2 {offsets = [0, 0], sizes = [1, 32], strides = [1, 1]} : vector<5x32xf32> to vector<1x32xf32>
    %36 = vector.broadcast %35 : vector<1x32xf32> to vector<16x32xf32>
    %37 = arith.addf %34, %36 : vector<16x32xf32>
    %cst_17 = arith.constant 0.176776692 : f32
    %38 = vector.broadcast %cst_17 : f32 to vector<16x32xf32>
    %39 = arith.mulf %37, %38 : vector<16x32xf32>
    %40 = arith.truncf %39 : vector<16x32xf32> to vector<16x32xbf16>
    %c0_18 = arith.constant 0 : index
    %c0_19 = arith.constant 0 : index
    %c0_20 = arith.constant 0 : index
    %41 = vector.load %arg6[%c0_18, %c0_19, %c0_20] : memref<7x32x32xbf16, #tpu.memory_space<vmem>>, vector<1x32x32xbf16>
    %42 = vector.shape_cast %41 : vector<1x32x32xbf16> to vector<32x32xbf16>
    %cst_21 = arith.constant dense<0.000000e+00> : vector<16x32xf32>
    %43 = tpu.matmul %40, %42, %cst_21 {dimension_numbers = #tpu.dot_dimension_numbers<[1], [0], [0], [1], [0, 0, 1, 1], [], []>} : vector<16x32xbf16>, vector<32x32xbf16>, vector<16x32xf32> -> vector<16x32xf32>
    %44 = arith.truncf %43 : vector<16x32xf32> to vector<16x32xbf16>
    %cst_22 = arith.constant dense<0.000000e+00> : vector<128xf32>
    %45 = vector.multi_reduction <add>, %15, %cst_22 [1] : vector<128x32xf32> to vector<128xf32>
    %46 = vector.shape_cast %45 : vector<128xf32> to vector<128x1xf32>
    %cst_23 = arith.constant 3.200000e+01 : f32
    %47 = vector.broadcast %cst_23 : f32 to vector<128x1xf32>
    %48 = arith.divf %46, %47 : vector<128x1xf32>
    %49 = vector.broadcast %48 : vector<128x1xf32> to vector<128x32xf32>
    %50 = arith.subf %15, %49 : vector<128x32xf32>
    %51 = arith.mulf %50, %50 : vector<128x32xf32>
    %cst_24 = arith.constant dense<0.000000e+00> : vector<128xf32>
    %52 = vector.multi_reduction <add>, %51, %cst_24 [1] : vector<128x32xf32> to vector<128xf32>
    %53 = vector.shape_cast %52 : vector<128xf32> to vector<128x1xf32>
    %cst_25 = arith.constant 3.200000e+01 : f32
    %54 = vector.broadcast %cst_25 : f32 to vector<128x1xf32>
    %55 = arith.divf %53, %54 : vector<128x1xf32>
    %cst_26 = arith.constant 9.99999974E-6 : f32
    %56 = vector.broadcast %cst_26 : f32 to vector<128x1xf32>
    %57 = arith.addf %55, %56 : vector<128x1xf32>
    %58 = math.rsqrt %57 : vector<128x1xf32>
    %59 = vector.broadcast %58 : vector<128x1xf32> to vector<128x32xf32>
    %60 = arith.mulf %50, %59 : vector<128x32xf32>
    %61 = vector.extract_strided_slice %1 {offsets = [1, 0], sizes = [1, 32], strides = [1, 1]} : vector<5x32xf32> to vector<1x32xf32>
    %62 = vector.broadcast %61 : vector<1x32xf32> to vector<128x32xf32>
    %63 = arith.mulf %60, %62 : vector<128x32xf32>
    %64 = vector.extract_strided_slice %2 {offsets = [1, 0], sizes = [1, 32], strides = [1, 1]} : vector<5x32xf32> to vector<1x32xf32>
    %65 = vector.broadcast %64 : vector<1x32xf32> to vector<128x32xf32>
    %66 = arith.addf %63, %65 : vector<128x32xf32>
    %67 = arith.truncf %66 : vector<128x32xf32> to vector<128x32xbf16>
    %c1 = arith.constant 1 : index
    %c0_27 = arith.constant 0 : index
    %c0_28 = arith.constant 0 : index
    %68 = vector.load %arg6[%c1, %c0_27, %c0_28] : memref<7x32x32xbf16, #tpu.memory_space<vmem>>, vector<1x32x32xbf16>
    %69 = vector.shape_cast %68 : vector<1x32x32xbf16> to vector<32x32xbf16>
    %cst_29 = arith.constant dense<0.000000e+00> : vector<128x32xf32>
    %70 = tpu.matmul %67, %69, %cst_29 {dimension_numbers = #tpu.dot_dimension_numbers<[1], [0], [0], [1], [0, 0, 1, 1], [], []>} : vector<128x32xbf16>, vector<32x32xbf16>, vector<128x32xf32> -> vector<128x32xf32>
    %71 = arith.truncf %70 : vector<128x32xf32> to vector<128x32xbf16>
    %cst_30 = arith.constant dense<0.000000e+00> : vector<128xf32>
    %72 = vector.multi_reduction <add>, %9, %cst_30 [1] : vector<128x32xf32> to vector<128xf32>
    %73 = vector.shape_cast %72 : vector<128xf32> to vector<128x1xf32>
    %cst_31 = arith.constant 3.200000e+01 : f32
    %74 = vector.broadcast %cst_31 : f32 to vector<128x1xf32>
    %75 = arith.divf %73, %74 : vector<128x1xf32>
    %76 = vector.broadcast %75 : vector<128x1xf32> to vector<128x32xf32>
    %77 = arith.subf %9, %76 : vector<128x32xf32>
    %78 = arith.mulf %77, %77 : vector<128x32xf32>
    %cst_32 = arith.constant dense<0.000000e+00> : vector<128xf32>
    %79 = vector.multi_reduction <add>, %78, %cst_32 [1] : vector<128x32xf32> to vector<128xf32>
    %80 = vector.shape_cast %79 : vector<128xf32> to vector<128x1xf32>
    %cst_33 = arith.constant 3.200000e+01 : f32
    %81 = vector.broadcast %cst_33 : f32 to vector<128x1xf32>
    %82 = arith.divf %80, %81 : vector<128x1xf32>
    %cst_34 = arith.constant 9.99999974E-6 : f32
    %83 = vector.broadcast %cst_34 : f32 to vector<128x1xf32>
    %84 = arith.addf %82, %83 : vector<128x1xf32>
    %85 = math.rsqrt %84 : vector<128x1xf32>
    %86 = vector.broadcast %85 : vector<128x1xf32> to vector<128x32xf32>
    %87 = arith.mulf %77, %86 : vector<128x32xf32>
    %88 = vector.extract_strided_slice %1 {offsets = [2, 0], sizes = [1, 32], strides = [1, 1]} : vector<5x32xf32> to vector<1x32xf32>
    %89 = vector.broadcast %88 : vector<1x32xf32> to vector<128x32xf32>
    %90 = arith.mulf %87, %89 : vector<128x32xf32>
    %91 = vector.extract_strided_slice %2 {offsets = [2, 0], sizes = [1, 32], strides = [1, 1]} : vector<5x32xf32> to vector<1x32xf32>
    %92 = vector.broadcast %91 : vector<1x32xf32> to vector<128x32xf32>
    %93 = arith.addf %90, %92 : vector<128x32xf32>
    %94 = arith.truncf %93 : vector<128x32xf32> to vector<128x32xbf16>
    %c2 = arith.constant 2 : index
    %c0_35 = arith.constant 0 : index
    %c0_36 = arith.constant 0 : index
    %95 = vector.load %arg6[%c2, %c0_35, %c0_36] : memref<7x32x32xbf16, #tpu.memory_space<vmem>>, vector<1x32x32xbf16>
    %96 = vector.shape_cast %95 : vector<1x32x32xbf16> to vector<32x32xbf16>
    %cst_37 = arith.constant dense<0.000000e+00> : vector<128x32xf32>
    %97 = tpu.matmul %94, %96, %cst_37 {dimension_numbers = #tpu.dot_dimension_numbers<[1], [0], [0], [1], [0, 0, 1, 1], [], []>} : vector<128x32xbf16>, vector<32x32xbf16>, vector<128x32xf32> -> vector<128x32xf32>
    %98 = arith.truncf %97 : vector<128x32xf32> to vector<128x32xbf16>
    %cst_38 = arith.constant dense<0.000000e+00> : vector<16x128xf32>
    %99 = tpu.matmul %44, %71, %cst_38 {dimension_numbers = #tpu.dot_dimension_numbers<[1], [1], [0], [0], [0, 0, 1, 0], [], []>} : vector<16x32xbf16>, vector<128x32xbf16>, vector<16x128xf32> -> vector<16x128xf32>
    %100 = tpu.iota {dimensions = array<i32: 0>} : vector<16x128xi32>
    %101 = tpu.iota {dimensions = array<i32: 1>} : vector<16x128xi32>
    %c0_i32 = arith.constant 0 : i32
    %102 = vector.broadcast %c0_i32 : i32 to vector<16x128xi32>
    %103 = arith.cmpi sge, %100, %102 : vector<16x128xi32>
    %c8_i32 = arith.constant 8 : i32
    %104 = vector.broadcast %c8_i32 : i32 to vector<16x128xi32>
    %105 = arith.cmpi slt, %100, %104 : vector<16x128xi32>
    %106 = arith.andi %103, %105 : vector<16x128xi1>
    %c0_i32_39 = arith.constant 0 : i32
    %107 = vector.broadcast %c0_i32_39 : i32 to vector<16x128xi32>
    %108 = arith.cmpi sge, %101, %107 : vector<16x128xi32>
    %109 = arith.andi %106, %108 : vector<16x128xi1>
    %c64_i32 = arith.constant 64 : i32
    %110 = vector.broadcast %c64_i32 : i32 to vector<16x128xi32>
    %111 = arith.cmpi slt, %101, %110 : vector<16x128xi32>
    %112 = arith.andi %109, %111 : vector<16x128xi1>
    %c8_i32_40 = arith.constant 8 : i32
    %113 = vector.broadcast %c8_i32_40 : i32 to vector<16x128xi32>
    %114 = arith.cmpi sge, %100, %113 : vector<16x128xi32>
    %c16_i32 = arith.constant 16 : i32
    %115 = vector.broadcast %c16_i32 : i32 to vector<16x128xi32>
    %116 = arith.cmpi slt, %100, %115 : vector<16x128xi32>
    %117 = arith.andi %114, %116 : vector<16x128xi1>
    %c64_i32_41 = arith.constant 64 : i32
    %118 = vector.broadcast %c64_i32_41 : i32 to vector<16x128xi32>
    %119 = arith.cmpi sge, %101, %118 : vector<16x128xi32>
    %120 = arith.andi %117, %119 : vector<16x128xi1>
    %c128_i32 = arith.constant 128 : i32
    %121 = vector.broadcast %c128_i32 : i32 to vector<16x128xi32>
    %122 = arith.cmpi slt, %101, %121 : vector<16x128xi32>
    %123 = arith.andi %120, %122 : vector<16x128xi1>
    %124 = arith.ori %112, %123 : vector<16x128xi1>
    %cst_42 = arith.constant -1.000000e+09 : f32
    %125 = vector.broadcast %cst_42 : f32 to vector<16x128xf32>
    %126 = arith.select %124, %99, %125 : vector<16x128xi1>, vector<16x128xf32>
    %cst_43 = arith.constant dense<0xFF800000> : vector<16xf32>
    %127 = vector.multi_reduction <maximumf>, %126, %cst_43 [1] : vector<16x128xf32> to vector<16xf32>
    %128 = vector.shape_cast %127 : vector<16xf32> to vector<16x1xf32>
    %129 = vector.broadcast %128 : vector<16x1xf32> to vector<16x128xf32>
    %130 = arith.subf %126, %129 : vector<16x128xf32>
    %131 = math.exp %130 : vector<16x128xf32>
    %cst_44 = arith.constant dense<0.000000e+00> : vector<16xf32>
    %132 = vector.multi_reduction <add>, %131, %cst_44 [1] : vector<16x128xf32> to vector<16xf32>
    %133 = vector.shape_cast %132 : vector<16xf32> to vector<16x1xf32>
    %134 = tpu.reciprocal %133 {approx = true} : vector<16x1xf32> -> vector<16x1xf32>
    %135 = vector.broadcast %134 : vector<16x1xf32> to vector<16x128xf32>
    %136 = arith.mulf %131, %135 : vector<16x128xf32>
    %137 = arith.truncf %136 : vector<16x128xf32> to vector<16x128xbf16>
    %cst_45 = arith.constant dense<0.000000e+00> : vector<16x32xf32>
    %138 = tpu.matmul %137, %98, %cst_45 {dimension_numbers = #tpu.dot_dimension_numbers<[1], [0], [0], [1], [0, 0, 1, 1], [], []>} : vector<16x128xbf16>, vector<128x32xbf16>, vector<16x32xf32> -> vector<16x32xf32>
    %139 = arith.truncf %138 : vector<16x32xf32> to vector<16x32xbf16>
    %c3 = arith.constant 3 : index
    %c0_46 = arith.constant 0 : index
    %c0_47 = arith.constant 0 : index
    %140 = vector.load %arg6[%c3, %c0_46, %c0_47] : memref<7x32x32xbf16, #tpu.memory_space<vmem>>, vector<1x32x32xbf16>
    %141 = vector.shape_cast %140 : vector<1x32x32xbf16> to vector<32x32xbf16>
    %cst_48 = arith.constant dense<0.000000e+00> : vector<16x32xf32>
    %142 = tpu.matmul %139, %141, %cst_48 {dimension_numbers = #tpu.dot_dimension_numbers<[1], [0], [0], [1], [0, 0, 1, 1], [], []>} : vector<16x32xbf16>, vector<32x32xbf16>, vector<16x32xf32> -> vector<16x32xf32>
    %143 = vector.broadcast %3 : vector<1x32xf32> to vector<16x32xf32>
    %144 = arith.addf %142, %143 : vector<16x32xf32>
    %145 = arith.addf %7, %144 : vector<16x32xf32>
    %cst_49 = arith.constant dense<0.000000e+00> : vector<16xf32>
    %146 = vector.multi_reduction <add>, %145, %cst_49 [1] : vector<16x32xf32> to vector<16xf32>
    %147 = vector.shape_cast %146 : vector<16xf32> to vector<16x1xf32>
    %cst_50 = arith.constant 3.200000e+01 : f32
    %148 = vector.broadcast %cst_50 : f32 to vector<16x1xf32>
    %149 = arith.divf %147, %148 : vector<16x1xf32>
    %150 = vector.broadcast %149 : vector<16x1xf32> to vector<16x32xf32>
    %151 = arith.subf %145, %150 : vector<16x32xf32>
    %152 = arith.mulf %151, %151 : vector<16x32xf32>
    %cst_51 = arith.constant dense<0.000000e+00> : vector<16xf32>
    %153 = vector.multi_reduction <add>, %152, %cst_51 [1] : vector<16x32xf32> to vector<16xf32>
    %154 = vector.shape_cast %153 : vector<16xf32> to vector<16x1xf32>
    %cst_52 = arith.constant 3.200000e+01 : f32
    %155 = vector.broadcast %cst_52 : f32 to vector<16x1xf32>
    %156 = arith.divf %154, %155 : vector<16x1xf32>
    %cst_53 = arith.constant 9.99999974E-6 : f32
    %157 = vector.broadcast %cst_53 : f32 to vector<16x1xf32>
    %158 = arith.addf %156, %157 : vector<16x1xf32>
    %159 = math.rsqrt %158 : vector<16x1xf32>
    %160 = vector.broadcast %159 : vector<16x1xf32> to vector<16x32xf32>
    %161 = arith.mulf %151, %160 : vector<16x32xf32>
    %162 = vector.extract_strided_slice %1 {offsets = [3, 0], sizes = [1, 32], strides = [1, 1]} : vector<5x32xf32> to vector<1x32xf32>
    %163 = vector.broadcast %162 : vector<1x32xf32> to vector<16x32xf32>
    %164 = arith.mulf %161, %163 : vector<16x32xf32>
    %165 = vector.extract_strided_slice %2 {offsets = [3, 0], sizes = [1, 32], strides = [1, 1]} : vector<5x32xf32> to vector<1x32xf32>
    %166 = vector.broadcast %165 : vector<1x32xf32> to vector<16x32xf32>
    %167 = arith.addf %164, %166 : vector<16x32xf32>
    %168 = arith.truncf %167 : vector<16x32xf32> to vector<16x32xbf16>
    %c4 = arith.constant 4 : index
    %c0_54 = arith.constant 0 : index
    %c0_55 = arith.constant 0 : index
    %169 = vector.load %arg6[%c4, %c0_54, %c0_55] : memref<7x32x32xbf16, #tpu.memory_space<vmem>>, vector<1x32x32xbf16>
    %170 = vector.shape_cast %169 : vector<1x32x32xbf16> to vector<32x32xbf16>
    %cst_56 = arith.constant dense<0.000000e+00> : vector<16x32xf32>
    %171 = tpu.matmul %168, %170, %cst_56 {dimension_numbers = #tpu.dot_dimension_numbers<[1], [0], [0], [1], [0, 0, 1, 1], [], []>} : vector<16x32xbf16>, vector<32x32xbf16>, vector<16x32xf32> -> vector<16x32xf32>
    %172 = arith.addf %145, %171 : vector<16x32xf32>
    %cst_57 = arith.constant dense<0.000000e+00> : vector<16xf32>
    %173 = vector.multi_reduction <add>, %172, %cst_57 [1] : vector<16x32xf32> to vector<16xf32>
    %174 = vector.shape_cast %173 : vector<16xf32> to vector<16x1xf32>
    %cst_58 = arith.constant 3.200000e+01 : f32
    %175 = vector.broadcast %cst_58 : f32 to vector<16x1xf32>
    %176 = arith.divf %174, %175 : vector<16x1xf32>
    %177 = vector.broadcast %176 : vector<16x1xf32> to vector<16x32xf32>
    %178 = arith.subf %172, %177 : vector<16x32xf32>
    %179 = arith.mulf %178, %178 : vector<16x32xf32>
    %cst_59 = arith.constant dense<0.000000e+00> : vector<16xf32>
    %180 = vector.multi_reduction <add>, %179, %cst_59 [1] : vector<16x32xf32> to vector<16xf32>
    %181 = vector.shape_cast %180 : vector<16xf32> to vector<16x1xf32>
    %cst_60 = arith.constant 3.200000e+01 : f32
    %182 = vector.broadcast %cst_60 : f32 to vector<16x1xf32>
    %183 = arith.divf %181, %182 : vector<16x1xf32>
    %cst_61 = arith.constant 9.99999974E-6 : f32
    %184 = vector.broadcast %cst_61 : f32 to vector<16x1xf32>
    %185 = arith.addf %183, %184 : vector<16x1xf32>
    %186 = math.rsqrt %185 : vector<16x1xf32>
    %187 = vector.broadcast %186 : vector<16x1xf32> to vector<16x32xf32>
    %188 = arith.mulf %178, %187 : vector<16x32xf32>
    %189 = vector.extract_strided_slice %1 {offsets = [4, 0], sizes = [1, 32], strides = [1, 1]} : vector<5x32xf32> to vector<1x32xf32>
    %190 = vector.broadcast %189 : vector<1x32xf32> to vector<16x32xf32>
    %191 = arith.mulf %188, %190 : vector<16x32xf32>
    %192 = vector.extract_strided_slice %2 {offsets = [4, 0], sizes = [1, 32], strides = [1, 1]} : vector<5x32xf32> to vector<1x32xf32>
    %193 = vector.broadcast %192 : vector<1x32xf32> to vector<16x32xf32>
    %194 = arith.addf %191, %193 : vector<16x32xf32>
    %195 = arith.truncf %194 : vector<16x32xf32> to vector<16x32xbf16>
    %c5 = arith.constant 5 : index
    %c0_62 = arith.constant 0 : index
    %c0_63 = arith.constant 0 : index
    %196 = vector.load %arg6[%c5, %c0_62, %c0_63] : memref<7x32x32xbf16, #tpu.memory_space<vmem>>, vector<1x32x32xbf16>
    %197 = vector.shape_cast %196 : vector<1x32x32xbf16> to vector<32x32xbf16>
    %cst_64 = arith.constant dense<0.000000e+00> : vector<16x32xf32>
    %198 = tpu.matmul %195, %197, %cst_64 {dimension_numbers = #tpu.dot_dimension_numbers<[1], [0], [0], [1], [0, 0, 1, 1], [], []>} : vector<16x32xbf16>, vector<32x32xbf16>, vector<16x32xf32> -> vector<16x32xf32>
    %199 = vector.broadcast %4 : vector<1x32xf32> to vector<16x32xf32>
    %200 = arith.addf %198, %199 : vector<16x32xf32>
    %cst_65 = arith.constant 5.000000e-01 : f32
    %201 = vector.broadcast %cst_65 : f32 to vector<16x32xf32>
    %202 = arith.mulf %201, %200 : vector<16x32xf32>
    %cst_66 = arith.constant 0.707106769 : f32
    %203 = vector.broadcast %cst_66 : f32 to vector<16x32xf32>
    %204 = arith.mulf %200, %203 : vector<16x32xf32>
    %205 = math.absf %204 : vector<16x32xf32>
    %cst_67 = arith.constant 0.327591091 : f32
    %206 = vector.broadcast %cst_67 : f32 to vector<16x32xf32>
    %207 = arith.mulf %206, %205 : vector<16x32xf32>
    %cst_68 = arith.constant 1.000000e+00 : f32
    %208 = vector.broadcast %cst_68 : f32 to vector<16x32xf32>
    %209 = arith.addf %208, %207 : vector<16x32xf32>
    %cst_69 = arith.constant 1.000000e+00 : f32
    %210 = vector.broadcast %cst_69 : f32 to vector<16x32xf32>
    %211 = arith.divf %210, %209 : vector<16x32xf32>
    %cst_70 = arith.constant 1.06140542 : f32
    %212 = vector.broadcast %cst_70 : f32 to vector<16x32xf32>
    %213 = arith.mulf %212, %211 : vector<16x32xf32>
    %cst_71 = arith.constant 1.45315206 : f32
    %214 = vector.broadcast %cst_71 : f32 to vector<16x32xf32>
    %215 = arith.subf %213, %214 : vector<16x32xf32>
    %216 = arith.mulf %215, %211 : vector<16x32xf32>
    %cst_72 = arith.constant 1.42141378 : f32
    %217 = vector.broadcast %cst_72 : f32 to vector<16x32xf32>
    %218 = arith.addf %216, %217 : vector<16x32xf32>
    %219 = arith.mulf %218, %211 : vector<16x32xf32>
    %cst_73 = arith.constant 0.284496725 : f32
    %220 = vector.broadcast %cst_73 : f32 to vector<16x32xf32>
    %221 = arith.subf %219, %220 : vector<16x32xf32>
    %222 = arith.mulf %221, %211 : vector<16x32xf32>
    %cst_74 = arith.constant 0.254829586 : f32
    %223 = vector.broadcast %cst_74 : f32 to vector<16x32xf32>
    %224 = arith.addf %222, %223 : vector<16x32xf32>
    %225 = arith.mulf %224, %211 : vector<16x32xf32>
    %cst_75 = arith.constant 0.000000e+00 : f32
    %226 = vector.broadcast %cst_75 : f32 to vector<16x32xf32>
    %227 = arith.subf %226, %204 : vector<16x32xf32>
    %228 = arith.mulf %227, %204 : vector<16x32xf32>
    %229 = math.exp %228 : vector<16x32xf32>
    %230 = arith.mulf %225, %229 : vector<16x32xf32>
    %cst_76 = arith.constant 1.000000e+00 : f32
    %231 = vector.broadcast %cst_76 : f32 to vector<16x32xf32>
    %232 = arith.subf %231, %230 : vector<16x32xf32>
    %cst_77 = arith.constant 0.000000e+00 : f32
    %233 = vector.broadcast %cst_77 : f32 to vector<16x32xf32>
    %234 = arith.cmpf olt, %204, %233 : vector<16x32xf32>
    %cst_78 = arith.constant 0.000000e+00 : f32
    %235 = vector.broadcast %cst_78 : f32 to vector<16x32xf32>
    %236 = arith.subf %235, %232 : vector<16x32xf32>
    %237 = arith.select %234, %236, %232 : vector<16x32xi1>, vector<16x32xf32>
    %cst_79 = arith.constant 1.000000e+00 : f32
    %238 = vector.broadcast %cst_79 : f32 to vector<16x32xf32>
    %239 = arith.addf %238, %237 : vector<16x32xf32>
    %240 = arith.mulf %202, %239 : vector<16x32xf32>
    %241 = arith.truncf %240 : vector<16x32xf32> to vector<16x32xbf16>
    %c6 = arith.constant 6 : index
    %c0_80 = arith.constant 0 : index
    %c0_81 = arith.constant 0 : index
    %242 = vector.load %arg6[%c6, %c0_80, %c0_81] : memref<7x32x32xbf16, #tpu.memory_space<vmem>>, vector<1x32x32xbf16>
    %243 = vector.shape_cast %242 : vector<1x32x32xbf16> to vector<32x32xbf16>
    %cst_82 = arith.constant dense<0.000000e+00> : vector<16x32xf32>
    %244 = tpu.matmul %241, %243, %cst_82 {dimension_numbers = #tpu.dot_dimension_numbers<[1], [0], [0], [1], [0, 0, 1, 1], [], []>} : vector<16x32xbf16>, vector<32x32xbf16>, vector<16x32xf32> -> vector<16x32xf32>
    %245 = vector.broadcast %5 : vector<1x32xf32> to vector<16x32xf32>
    %246 = arith.addf %244, %245 : vector<16x32xf32>
    %247 = arith.addf %172, %246 : vector<16x32xf32>
    %248 = vector.shape_cast %247 : vector<16x32xf32> to vector<2x8x32xf32>
    %c0_83 = arith.constant 0 : index
    %c0_84 = arith.constant 0 : index
    %c0_85 = arith.constant 0 : index
    %249 = vector.load %arg7[%c0_83, %c0_84, %c0_85] : memref<2x8x32xf32, #tpu.memory_space<vmem>>, vector<2x8x32xf32>
    tpu.vector_store %arg7[%c0_83, %c0_84, %c0_85], %248 {strides = array<i32>} : memref<2x8x32xf32, #tpu.memory_space<vmem>>, vector<2x8x32xf32>,
    return
  }
  func.func @transform_0(%arg0: i32) -> (i32, i32, i32) {
    %c0_i32 = arith.constant 0 : i32
    %c0_i32_0 = arith.constant 0 : i32
    %c0_i32_1 = arith.constant 0 : i32
    return %arg0, %c0_i32, %c0_i32_0 : i32, i32, i32
  }
  func.func @transform_1(%arg0: i32) -> (i32, i32, i32) {
    %c0_i32 = arith.constant 0 : i32
    %c0_i32_0 = arith.constant 0 : i32
    %c0_i32_1 = arith.constant 0 : i32
    return %arg0, %c0_i32, %c0_i32_0 : i32, i32, i32
  }
  func.func @transform_2(%arg0: i32) -> (i32, i32, i32) {
    %c0_i32 = arith.constant 0 : i32
    %c0_i32_0 = arith.constant 0 : i32
    %c0_i32_1 = arith.constant 0 : i32
    return %arg0, %c0_i32, %c0_i32_0 : i32, i32, i32
  }
  func.func @transform_3(%arg0: i32) -> (i32, i32, i32) {
    %c0_i32 = arith.constant 0 : i32
    %c0_i32_0 = arith.constant 0 : i32
    %c0_i32_1 = arith.constant 0 : i32
    return %arg0, %c0_i32, %c0_i32_0 : i32, i32, i32
  }
  func.func @transform_4(%arg0: i32) -> (i32, i32) {
    %c0_i32 = arith.constant 0 : i32
    %c0_i32_0 = arith.constant 0 : i32
    %c0_i32_1 = arith.constant 0 : i32
    return %c0_i32, %c0_i32_0 : i32, i32
  }
  func.func @transform_5(%arg0: i32) -> (i32, i32, i32) {
    %c0_i32 = arith.constant 0 : i32
    %c0_i32_0 = arith.constant 0 : i32
    %c0_i32_1 = arith.constant 0 : i32
    %c0_i32_2 = arith.constant 0 : i32
    return %c0_i32, %c0_i32_0, %c0_i32_1 : i32, i32, i32
  }
  func.func @transform_6(%arg0: i32) -> (i32, i32, i32) {
    %c0_i32 = arith.constant 0 : i32
    %c0_i32_0 = arith.constant 0 : i32
    %c0_i32_1 = arith.constant 0 : i32
    return %arg0, %c0_i32, %c0_i32_0 : i32, i32, i32
  }
}

</mosaic_0001>

<bundles_post_ra>
// kernel: tpu_custom_call.1
= control target key start
LH: loop header
LB: loop body
LE: loop exit
PB: predicated region body
PF: predicated region fallthrough
CT: control target
= control target key end

     0   :  { %vm81_vm0 = vcmask 261120   ;;  %s3040_s0 = inlined_call_operand.vmem [shape: f32[2,8,32], index: 0, kind: input, shape index: {}]   ;;  %s3041_s1 = inlined_call_operand.vmem [shape: f32[2,64,32], index: 1, kind: input, shape index: {}]   ;;  %s3042_s2 = inlined_call_operand.vmem [shape: f32[2,8,32], index: 2, kind: input, shape index: {}]   ;;  %s3043_s3 = inlined_call_operand.vmem [shape: f32[2,64,32], index: 3, kind: input, shape index: {}]   ;;  %s3044_s4 = inlined_call_operand.vmem [shape: f32[13,32], index: 4, kind: input, shape index: {}]   ;;  %s3045_s5 = inlined_call_operand.vmem [shape: bf16[7,32,32], index: 5, kind: input, shape index: {}]   ;;  %s3046_s6 = inlined_call_operand.hbm [shape: f32[2,8,32], index: 6, kind: output, shape index: {}]  }
   0x1   :  { %v1919_v0 = vld [vmem:[%s3041_s1 + $0x10] sm:$0xff]  ;;  %v1927_v2 = vld [vmem:[%s3041_s1] sm:$0xff]  ;;  %v1939_v6 = vld [vmem:[%s3041_s1 + $0x18] sm:$0xff] }
   0x2   :  { %v51_v1 = vld [vmem:[%s3043_s3 + $0x10] sm:$0xff]  ;;  %v49_v4 = vld [vmem:[%s3043_s3] sm:$0xff]  ;;  %v52_v7 = vld [vmem:[%s3043_s3 + $0x18] sm:$0xff] }
   0x3   :  { %v1930_v3 = vadd.f32 %v51_v1, %v1919_v0  ;;  %v65_v5 = vadd.f32 %v49_v4, %v1927_v2  ;;  %v1947_v8 = vld [vmem:[%s3041_s1 + $0x20] sm:$0xff]  ;;  %v1954_v10 = vld [vmem:[%s3041_s1 + $0x8] sm:$0xff] }
   0x4   :  { %v50_v11 = vld [vmem:[%s3043_s3 + $0x8] sm:$0xff]  ;;  %v53_v12 = vld [vmem:[%s3043_s3 + $0x20] sm:$0xff] }
   0x5   :  { %v182_v9 = vsel %vm81_vm0, %v1930_v3, 0.0  ;;  %v176_v13 = vsel %vm81_vm0, %v65_v5, 0.0  ;;  %v69_v14 = vadd.f32 %v53_v12, %v1947_v8 }
   0x6   :  { %183 = vadd.xlane.f32.xlu1 %v182_v9 }
   0x7   :  { %11 = vsyncpa [#allocation3], 0  ;;  %177 = vadd.xlane.f32.xlu0 %v176_v13  ;;  %v68_v15 = vadd.f32 %v52_v7, %v1939_v6  ;;  %v1968_v16 = vld [vmem:[%s3041_s1 + $0x28] sm:$0xff]  ;;  %v66_v18 = vadd.f32 %v50_v11, %v1954_v10  ;;  %v188_v19 = vsel %vm81_vm0, %v69_v14, 0.0  ;;  %v1982_v24 = vld [vmem:[%s3041_s1 + $0x30] sm:$0xff]  ;;  %v1877_v28 = vmov 32.0  }
   0x8   :  { %v54_v17 = vld [vmem:[%s3043_s3 + $0x28] sm:$0xff]  ;;  %189 = vadd.xlane.f32.xlu2 %v188_v19  ;;  %v55_v25 = vld [vmem:[%s3043_s3 + $0x30] sm:$0xff]  ;;  %1740 = vrcp.f32 %v1877_v28  ;;  %v2002_v41 = vld [vmem:[%s3041_s1 + $0x38] sm:$0xff]  ;;  %s1604_s9 = sshll.u32 %s3046_s6, 4  ;;  %s1879_s10 = smov 128   ;;  %s1605_s9 = int_to_ptr.hbm [resolvable:$true] %s1604_s9 }
   0x9   :  { %v70_v20 = vadd.f32 %v54_v17, %v1968_v16  ;;  %v185_v21 = vsel %vm81_vm0, %v68_v15, 0.0  ;;  %v179_v22 = vsel %vm81_vm0, %v66_v18, 0.0  ;;  %v1988_v26 = vadd.f32 %v55_v25, %v1982_v24  ;;  %v56_v42 = vld [vmem:[%s3043_s3 + $0x38] sm:$0xff]  ;;  %v2034_v60 = vld [vmem:[%s3041_s1 + $0x40] sm:$0xff]  ;;  %v58_v17 = vld [vmem:[%s3043_s3 + $0x48] sm:$0xff]  ;;  %s1880_s11 = smov 8  }
   0xa   :  { %v2013_v50 = vadd.f32 %v56_v42, %v2002_v41  ;;  %v57_v61 = vld [vmem:[%s3043_s3 + $0x40] sm:$0xff]  ;;  %v40_v12 = vld [vmem:[%s3041_s1 + $0x58] sm:$0xff] }
   0xb   :  { %v191_v23 = vsel %vm81_vm0, %v70_v20, 0.0  ;;  %v194_v27 = vsel %vm81_vm0, %v1988_v26, 0.0  ;;  %v60_v13 = vld [vmem:[%s3043_s3 + $0x58] sm:$0xff]  ;;  %v41_v28 = vld [vmem:[%s3041_s1 + $0x60] sm:$0xff] }
   0xc   :  { %v197_v57 = vsel %vm81_vm0, %v2013_v50, 0.0 }
   0xe   :  { %186 = vadd.xlane.f32.xlu1 %v185_v21  ;;  %v1741_v29 = vpop.eup %1740 }
   0xf   :  { %180 = vadd.xlane.f32.xlu0 %v179_v22  ;;  %v89_v30 = vmul.f32 32.0, %v1741_v29  ;;  %vm93_vm1 = vweird.f32 %v1741_v29 }
  0x10   :  { %192 = vadd.xlane.f32.xlu2 %v191_v23 }
  0x11   :  { %v90_v31 = vsub.f32 1.0, %v89_v30  ;;  %v39_v30 = vld [vmem:[%s3041_s1 + $0x50] sm:$0xff] }
  0x13   :  { %v91_v32 = vmul.f32 %v1741_v29, %v90_v31 }
  0x15   :  { %v92_v33 = vadd.f32 %v1741_v29, %v91_v32 }
  0x17   :  { %v1992_v34 = vsel %vm93_vm1, %v1741_v29, %v92_v33  ;;  %v61_v29 = vld [vmem:[%s3043_s3 + $0x60] sm:$0xff] }
  0x18   :  { %195 = vadd.xlane.f32.xlu2 %v194_v27  ;;  %v2093_v31 = vadd.f32 %v61_v29, %v41_v28 }
  0x79   :  { %v184_v35 = vpop.xlane.xlu1 %183 }
  0x7a   :  { %v178_v36 = vpop.xlane.xlu0 %177  ;;  %v226_v48 = vmul.f32 %v184_v35, %v1992_v34  ;;  %v212_v35 = vsel %vm81_vm0, %v2093_v31, 0.0 }
  0x7b   :  { %v224_v37 = vmul.f32 %v178_v36, %v1992_v34  ;;  %v190_v38 = vpop.xlane.xlu2 %189 }
  0x7c   :  { %v228_v47 = vmul.f32 %v190_v38, %v1992_v34  ;;  %v2024_v56 = vsub.f32 %v1930_v3, %v226_v48  ;;  %v2044_v3 = vadd.f32 %v57_v61, %v2034_v60  ;;  %v42_v38 = vld [vmem:[%s3041_s1 + $0x68] sm:$0xff]  ;;  %v1725_v48 = vld [vmem:[%s3045_s5 + $0x18] sm:$0xff] }
  0x7d   :  { %v1995_v39 = vsub.f32 %v65_v5, %v224_v37  ;;  %617 = vmatpush.bf16.msra.mxu1 %v1725_v48 }
  0x7e   :  { %v2019_v53 = vsub.f32 %v69_v14, %v228_v47  ;;  %v258_v4 = vmul.f32 %v2024_v56, %v2024_v56  ;;  %v200_v9 = vsel %vm81_vm0, %v2044_v3, 0.0 }
  0x7f   :  { %v256_v40 = vmul.f32 %v1995_v39, %v1995_v39 }
  0x80   :  { %v260_v63 = vmul.f32 %v2019_v53, %v2019_v53  ;;  %v278_v11 = vsel %vm81_vm0, %v258_v4, 0.0 }
  0x81   :  { %v187_v43 = vpop.xlane.xlu1 %186  ;;  %v272_v44 = vsel %vm81_vm0, %v256_v40, 0.0  ;;  %v62_v40 = vld [vmem:[%s3043_s3 + $0x68] sm:$0xff] }
  0x82   :  { %v227_v45 = vmul.f32 %v187_v43, %v1992_v34  ;;  %273 = vadd.xlane.f32.xlu0 %v272_v44  ;;  %v181_v46 = vpop.xlane.xlu0 %180  ;;  %v284_v5 = vsel %vm81_vm0, %v260_v63, 0.0  ;;  %v2110_v42 = vadd.f32 %v62_v40, %v42_v38  ;;  %v43_v44 = vld [vmem:[%s3041_s1 + $0x70] sm:$0xff] }
  0x83   :  { %v225_v49 = vmul.f32 %v181_v46, %v1992_v34  ;;  %v193_v55 = vpop.xlane.xlu2 %192 }
  0x84   :  { %v2015_v51 = vsub.f32 %v68_v15, %v227_v45  ;;  %v229_v1 = vmul.f32 %v193_v55, %v1992_v34  ;;  %v38_v15 = vld [vmem:[%s3041_s1 + $0x48] sm:$0xff]  ;;  %v215_v43 = vsel %vm81_vm0, %v2110_v42, 0.0  ;;  %v63_v45 = vld [vmem:[%s3043_s3 + $0x70] sm:$0xff] }
  0x85   :  { %v2017_v52 = vsub.f32 %v66_v18, %v225_v49  ;;  %v2066_v18 = vadd.f32 %v60_v13, %v40_v12  ;;  %v2071_v21 = vadd.f32 %v58_v17, %v38_v15  ;;  %v2120_v46 = vadd.f32 %v63_v45, %v43_v44  ;;  %v64_v45 = vld [vmem:[%s3043_s3 + $0x78] sm:$0xff] }
  0x86   :  { %v259_v54 = vmul.f32 %v2015_v51, %v2015_v51  ;;  %v2049_v7 = vsub.f32 %v70_v20, %v229_v1 }
  0x87   :  { %v257_v58 = vmul.f32 %v2017_v52, %v2017_v52  ;;  %v209_v22 = vsel %vm81_vm0, %v2066_v18, 0.0  ;;  %v203_v27 = vsel %vm81_vm0, %v2071_v21, 0.0  ;;  %v218_v47 = vsel %vm81_vm0, %v2120_v46, 0.0 }
  0x88   :  { %v281_v59 = vsel %vm81_vm0, %v259_v54, 0.0  ;;  %v261_v20 = vmul.f32 %v2049_v7, %v2049_v7 }
  0x89   :  { %282 = vadd.xlane.f32.xlu2 %v281_v59  ;;  %v275_v62 = vsel %vm81_vm0, %v257_v58, 0.0 }
  0x8a   :  { %198 = vadd.xlane.f32.xlu0 %v197_v57  ;;  %276 = vadd.xlane.f32.xlu1 %v275_v62  ;;  %v287_v25 = vsel %vm81_vm0, %v261_v20, 0.0  ;;  %v1724_v57 = vld [vmem:[%s3045_s5 + $0x10] sm:$0xff] }
  0x8b   :  { %v196_v14 = vpop.xlane.xlu2 %195  ;;  %618 = vmatpush.bf16.msra.mxu1 %v1724_v57 }
  0x8c   :  { %v230_v19 = vmul.f32 %v196_v14, %v1992_v34 }
  0x8e   :  { %v2076_v23 = vsub.f32 %v1988_v26, %v230_v19  ;;  %v59_v26 = vld [vmem:[%s3043_s3 + $0x50] sm:$0xff] }
  0x8f   :  { %v2097_v33 = vadd.f32 %v59_v26, %v39_v30 }
  0x90   :  { %v262_v32 = vmul.f32 %v2076_v23, %v2076_v23 }
  0x91   :  { %285 = vadd.xlane.f32.xlu2 %v284_v5  ;;  %v206_v37 = vsel %vm81_vm0, %v2097_v33, 0.0 }
  0x92   :  { %201 = vadd.xlane.f32.xlu0 %v200_v9  ;;  %279 = vadd.xlane.f32.xlu1 %v278_v11  ;;  %v290_v36 = vsel %vm81_vm0, %v262_v32, 0.0 }
  0x99   :  { %210 = vadd.xlane.f32.xlu2 %v209_v22 }
  0x9a   :  { %288 = vadd.xlane.f32.xlu0 %v287_v25  ;;  %204 = vadd.xlane.f32.xlu1 %v203_v27 }
  0xa1   :  { %213 = vadd.xlane.f32.xlu2 %v212_v35 }
  0xa2   :  { %291 = vadd.xlane.f32.xlu0 %v290_v36  ;;  %207 = vadd.xlane.f32.xlu1 %v206_v37 }
  0xaa   :  { %216 = vadd.xlane.f32.xlu0 %v215_v43 }
  0xb2   :  { %219 = vadd.xlane.f32.xlu0 %v218_v47 }
  0xf5   :  { %v274_v49 = vpop.xlane.xlu0 %273 }
  0xf6   :  { %v320_v54 = vmul.f32 %v274_v49, %v1992_v34 }
  0xf8   :  { %v336_v55 = vadd.f32 1e-05, %v320_v54 }
  0xfa   :  { %1742 = vrsqrt.f32 %v336_v55  ;;  %vm358_vm3 = vweird.f32 %v336_v55 }
  0xfc   :  { %v283_v58 = vpop.xlane.xlu2 %282 }
  0xfd   :  { %v323_v59 = vmul.f32 %v283_v58, %v1992_v34  ;;  %v277_v61 = vpop.xlane.xlu1 %276  ;;  %v199_v62 = vpop.xlane.xlu0 %198  ;;  %v2177_v58 = vld [vmem:[%s3044_s4] sm:$0xff] }
  0xfe   :  { %v321_v63 = vmul.f32 %v277_v61, %v1992_v34  ;;  %v231_v1 = vmul.f32 %v199_v62, %v1992_v34 }
  0xff   :  { %v2134_v4 = vadd.f32 1e-05, %v323_v59 }
 0x100   :  { %v1743_v5 = vpop.eup %1742  ;;  %v337_v9 = vadd.f32 1e-05, %v321_v63  ;;  %v2137_v11 = vsub.f32 %v2013_v50, %v231_v1 }
 0x101   :  { %v353_v12 = vmul.f32 %v1743_v5, %v336_v55  ;;  %1744 = vrsqrt.f32 %v2134_v4  ;;  %vm359_vm2 = vweird.f32 %v1743_v5  ;;  %vm388_vm10 = vweird.f32 %v2134_v4 }
 0x102   :  { %1746 = vrsqrt.f32 %v337_v9  ;;  %v263_v13 = vmul.f32 %v2137_v11, %v2137_v11  ;;  %vm368_vm4 = vweird.f32 %v337_v9  ;;  %vm2168_vm5 = vmor %vm358_vm3, %vm359_vm2 }
 0x103   :  { %v354_v14 = vmul.f32 %v1743_v5, %v353_v12 }
 0x104   :  { %v286_v15 = vpop.xlane.xlu2 %285  ;;  %v293_v17 = vsel %vm81_vm0, %v263_v13, 0.0 }
 0x105   :  { %v355_v19 = vmul.f32 0.5, %v354_v14  ;;  %v280_v20 = vpop.xlane.xlu1 %279  ;;  %294 = vadd.xlane.f32.xlu1 %v293_v17  ;;  %v202_v22 = vpop.xlane.xlu0 %201  ;;  %v324_v30 = vmul.f32 %v286_v15, %v1992_v34  ;;  %v2199_v15 = vperm.slane %v2177_v58, 1 }
 0x106   :  { %v322_v25 = vmul.f32 %v280_v20, %v1992_v34  ;;  %v232_v50 = vmul.f32 %v202_v22, %v1992_v34 }
 0x107   :  { %v2145_v27 = vpop.eup %1744  ;;  %v356_v28 = vsub.f32 1.5, %v355_v19  ;;  %v2158_v43 = vadd.f32 1e-05, %v324_v30 }
 0x108   :  { %v1747_v29 = vpop.eup %1746  ;;  %v2148_v26 = vadd.f32 1e-05, %v322_v25  ;;  %v2151_v32 = vsub.f32 %v2044_v3, %v232_v50  ;;  %v383_v37 = vmul.f32 %v2145_v27, %v2134_v4  ;;  %v2163_v3 = vld [vmem:[%s3041_s1 + $0x78] sm:$0xff]  ;;  %vm389_vm11 = vweird.f32 %v2145_v27 }
 0x109   :  { %v363_v35 = vmul.f32 %v1747_v29, %v337_v9  ;;  %v357_v36 = vmul.f32 %v1743_v5, %v356_v28  ;;  %vm369_vm6 = vweird.f32 %v1747_v29  ;;  %v2188_v13 = vadd.f32 %v64_v45, %v2163_v3  ;;  %vm2253_vm13 = vmor %vm388_vm10, %vm389_vm11 }
 0x10a   :  { %1748 = vrsqrt.f32 %v2148_v26  ;;  %v264_v40 = vmul.f32 %v2151_v32, %v2151_v32  ;;  %v384_v61 = vmul.f32 %v2145_v27, %v383_v37  ;;  %vm370_vm7 = vmor %vm368_vm4, %vm369_vm6  ;;  %vm378_vm8 = vweird.f32 %v2148_v26 }
 0x10b   :  { %v364_v38 = vmul.f32 %v1747_v29, %v363_v35  ;;  %v361_v59 = vsel %vm2168_vm5, %v1743_v5, %v357_v36  ;;  %1750 = vrsqrt.f32 %v2158_v43  ;;  %v2218_v36 = vperm.slane %v2177_v58, 6 }
 0x10c   :  { %v211_v44 = vpop.xlane.xlu2 %210  ;;  %v296_v55 = vsel %vm81_vm0, %v264_v40, 0.0  ;;  %v512_v17 = vmul.f32 %v361_v59, %v1995_v39  ;;  %v385_v22 = vmul.f32 0.5, %v384_v61  ;;  %v221_v39 = vsel %vm81_vm0, %v2188_v13, 0.0 }
 0x10d   :  { %v365_v48 = vmul.f32 0.5, %v364_v38  ;;  %v235_v49 = vmul.f32 %v211_v44, %v1992_v34  ;;  %v205_v54 = vpop.xlane.xlu1 %204  ;;  %v289_v57 = vpop.xlane.xlu0 %288  ;;  %297 = vadd.xlane.f32.xlu1 %v296_v55  ;;  %vm398_vm1 = vweird.f32 %v2158_v43 }
 0x10e   :  { %v233_v62 = vmul.f32 %v205_v54, %v1992_v34  ;;  %v325_v63 = vmul.f32 %v289_v57, %v1992_v34  ;;  %v529_v45 = vmul.f32 %v2199_v15, %v512_v17  ;;  %v386_v47 = vsub.f32 1.5, %v385_v22 }
 0x10f   :  { %v366_v1 = vsub.f32 1.5, %v365_v48  ;;  %v2185_v12 = vsub.f32 %v2066_v18, %v235_v49 }
 0x110   :  { %v2190_v14 = vpop.eup %1748  ;;  %v2196_v5 = vsub.f32 %v2071_v21, %v233_v62  ;;  %v2204_v20 = vadd.f32 1e-05, %v325_v63 }
 0x111   :  { %v367_v18 = vmul.f32 %v1747_v29, %v366_v1  ;;  %v373_v19 = vmul.f32 %v2190_v14, %v2148_v26  ;;  %v267_v9 = vmul.f32 %v2185_v12, %v2185_v12  ;;  %vm379_vm9 = vweird.f32 %v2190_v14 }
 0x112   :  { %v265_v25 = vmul.f32 %v2196_v5, %v2196_v5  ;;  %1752 = vrsqrt.f32 %v2204_v20  ;;  %vm2242_vm12 = vmor %vm378_vm8, %vm379_vm9  ;;  %v387_v1 = vmul.f32 %v2145_v27, %v386_v47  ;;  %vm408_vm14 = vweird.f32 %v2204_v20 }
 0x113   :  { %v371_v21 = vsel %vm370_vm7, %v1747_v29, %v367_v18  ;;  %v374_v50 = vmul.f32 %v2190_v14, %v373_v19  ;;  %v305_v35 = vsel %vm81_vm0, %v267_v9, 0.0 }
 0x114   :  { %v513_v28 = vmul.f32 %v371_v21, %v2017_v52  ;;  %v214_v30 = vpop.xlane.xlu2 %213  ;;  %306 = vadd.xlane.f32.xlu0 %v305_v35  ;;  %v299_v38 = vsel %vm81_vm0, %v265_v25, 0.0  ;;  %v2225_v52 = vpop.eup %1750 }
 0x115   :  { %v375_v37 = vmul.f32 0.5, %v374_v50  ;;  %v236_v29 = vmul.f32 %v214_v30, %v1992_v34  ;;  %v208_v40 = vpop.xlane.xlu1 %207  ;;  %v2222_v44 = vpop.xlane.xlu0 %291  ;;  %300 = vadd.xlane.f32.xlu2 %v299_v38  ;;  %222 = vadd.xlane.f32.xlu1 %v221_v39  ;;  %v391_v50 = vsel %vm2253_vm13, %v2145_v27, %v387_v1  ;;  %vm399_vm2 = vweird.f32 %v2225_v52 }
 0x116   :  { %v234_v48 = vmul.f32 %v208_v40, %v1992_v34  ;;  %v530_v49 = vmul.f32 %v2199_v15, %v513_v28  ;;  %vm400_vm4 = vmor %vm398_vm1, %vm399_vm2 }
 0x117   :  { %v376_v54 = vsub.f32 1.5, %v375_v37  ;;  %v2231_v55 = vsub.f32 %v2093_v31, %v236_v29  ;;  %v546_v31 = vadd.f32 %v2218_v36, %v529_v45  ;;  %v515_v29 = vmul.f32 %v391_v50, %v2015_v51  ;;  %v45_v51 = vld [vmem:[%s3042_s2] sm:$0xff] }
 0x118   :  { %v2236_v57 = vsub.f32 %v2097_v33, %v234_v48  ;;  %v547_v59 = vadd.f32 %v2218_v36, %v530_v49  ;;  %v1753_v61 = vpop.eup %1752  ;;  %v393_v33 = vmul.f32 %v2225_v52, %v2158_v43 }
 0x119   :  { %v377_v62 = vmul.f32 %v2190_v14, %v376_v54  ;;  %v268_v4 = vmul.f32 %v2231_v55, %v2231_v55  ;;  %v403_v17 = vmul.f32 %v1753_v61, %v2204_v20  ;;  %v532_v49 = vmul.f32 %v2199_v15, %v515_v29 }
 0x11a   :  { %v562_v26 = vpack.c.bf16 %v547_v59, %v546_v31  ;;  %v266_v9 = vmul.f32 %v2236_v57, %v2236_v57  ;;  %v394_v39 = vmul.f32 %v2225_v52, %v393_v33  ;;  %vm409_vm15 = vweird.f32 %v1753_v61  ;;  %v28_v33 = vld [vmem:[%s3040_s0 + $0x8] sm:$0xff] }
 0x11b   :  { %v381_v19 = vsel %vm2242_vm12, %v2190_v14, %v377_v62  ;;  %v404_v22 = vmul.f32 %v1753_v61, %v403_v17  ;;  %v308_v25 = vsel %vm81_vm0, %v268_v4, 0.0  ;;  %vm410_vm3 = vmor %vm408_vm14, %vm409_vm15  ;;  %v549_v4 = vadd.f32 %v2218_v36, %v532_v49 }
 0x11c   :  { %1637 = vmatmul.msk.bf16.vlgmr.msra.gmra.mxu1 %vm81_vm0, %v562_v26  ;;  %v302_v28 = vsel %vm81_vm0, %v266_v9, 0.0  ;;  %v514_v30 = vmul.f32 %v381_v19, %v2024_v56  ;;  %v395_v38 = vmul.f32 0.5, %v394_v39  ;;  %v27_v56 = vld [vmem:[%s3040_s0] sm:$0xff] }
 0x11d   :  { %v217_v21 = vpop.xlane.xlu0 %216  ;;  %309 = vadd.xlane.f32.xlu1 %v308_v25  ;;  %303 = vadd.xlane.f32.xlu2 %v302_v28  ;;  %v405_v35 = vmul.f32 0.5, %v404_v22  ;;  %v2294_v31 = vadd.f32 %v45_v51, %v27_v56 }
 0x11e   :  { %v237_v14 = vmul.f32 %v217_v21, %v1992_v34  ;;  %v531_v40 = vmul.f32 %v2199_v15, %v514_v30  ;;  %v677_v30 = vsel %vm81_vm0, %v1939_v6, 0.0 }
 0x11f   :  { %v406_v45 = vsub.f32 1.5, %v405_v35  ;;  %v82_v26 = vsel %vm81_vm0, %v2294_v31, 0.0 }
 0x120   :  { %v2272_v37 = vsub.f32 %v2110_v42, %v237_v14  ;;  %v396_v42 = vsub.f32 1.5, %v395_v38  ;;  %v548_v59 = vadd.f32 %v2218_v36, %v531_v40 }
 0x121   :  { %v407_v62 = vmul.f32 %v1753_v61, %v406_v45 }
 0x122   :  { %v269_v27 = vmul.f32 %v2272_v37, %v2272_v37  ;;  %v397_v20 = vmul.f32 %v2225_v52, %v396_v42  ;;  %v563_v43 = vpack.c.bf16 %v549_v4, %v548_v59 }
 0x123   :  { %v411_v17 = vsel %vm410_vm3, %v1753_v61, %v407_v62 }
 0x124   :  { %v311_v47 = vsel %vm81_vm0, %v269_v27, 0.0  ;;  %v401_v19 = vsel %vm400_vm4, %v2225_v52, %v397_v20  ;;  %v517_v9 = vmul.f32 %v411_v17, %v2049_v7  ;;  %v668_v52 = vsel %vm81_vm0, %v1927_v2, 0.0 }
 0x125   :  { %v220_v48 = vpop.xlane.xlu0 %219  ;;  %312 = vadd.xlane.f32.xlu2 %v311_v47  ;;  %v516_v25 = vmul.f32 %v401_v19, %v2019_v53  ;;  %v326_v53 = vmul.f32 %v2222_v44, %v1992_v34 }
 0x126   :  { %v238_v54 = vmul.f32 %v220_v48, %v1992_v34  ;;  %v534_v21 = vmul.f32 %v2199_v15, %v517_v9 }
 0x127   :  { %v533_v50 = vmul.f32 %v2199_v15, %v516_v25  ;;  %v342_v7 = vadd.f32 1e-05, %v326_v53 }
 0x128   :  { %v2292_v63 = vsub.f32 %v2120_v46, %v238_v54  ;;  %v46_v46 = vld [vmem:[%s3042_s2 + $0x8] sm:$0xff]  ;;  %v551_v39 = vadd.f32 %v2218_v36, %v534_v21 }
 0x129   :  { %v2311_v22 = vadd.f32 %v46_v46, %v28_v33  ;;  %v550_v28 = vadd.f32 %v2218_v36, %v533_v50  ;;  %1754 = vrsqrt.f32 %v342_v7  ;;  %vm418_vm5 = vweird.f32 %v342_v7 }
 0x12a   :  { %v270_v1 = vmul.f32 %v2292_v63, %v2292_v63 }
 0x12b   :  { %v85_v61 = vsel %vm81_vm0, %v2311_v22, 0.0  ;;  %v564_v14 = vpack.c.bf16 %v551_v39, %v550_v28 }
 0x12c   :  { %v314_v18 = vsel %vm81_vm0, %v270_v1, 0.0  ;;  %1638 = vmatmul.msk.bf16.gmra.mxu1 %vm81_vm0, %v563_v43 }
 0x12d   :  { %315 = vadd.xlane.f32.xlu0 %v314_v18  ;;  %83 = vadd.xlane.f32.xlu2 %v82_v26 }
 0x12f   :  { %v1755_v35 = vpop.eup %1754 }
 0x130   :  { %v413_v29 = vmul.f32 %v1755_v35, %v342_v7  ;;  %vm419_vm6 = vweird.f32 %v1755_v35 }
 0x131   :  { %vm420_vm7 = vmor %vm418_vm5, %vm419_vm6 }
 0x132   :  { %v414_v38 = vmul.f32 %v1755_v35, %v413_v29 }
 0x134   :  { %v415_v47 = vmul.f32 0.5, %v414_v38 }
 0x135   :  { %86 = vadd.xlane.f32.xlu0 %v85_v61 }
 0x136   :  { %v416_v48 = vsub.f32 1.5, %v415_v47 }
 0x138   :  { %v417_v51 = vmul.f32 %v1755_v35, %v416_v48 }
 0x13a   :  { %v421_v62 = vsel %vm420_vm7, %v1755_v35, %v417_v51 }
 0x13b   :  { %v518_v26 = vmul.f32 %v421_v62, %v2076_v23 }
 0x13c   :  { %1639 = vmatmul.msk.bf16.gmra.mxu1 %vm81_vm0, %v564_v14 }
 0x13d   :  { %669 = vadd.xlane.f32.xlu0 %v668_v52  ;;  %v535_v53 = vmul.f32 %v2199_v15, %v518_v26 }
 0x13f   :  { %v552_v47 = vadd.f32 %v2218_v36, %v535_v53 }
 0x145   :  { %678 = vadd.xlane.f32.xlu0 %v677_v30 }
 0x178   :  { %v295_v27 = vpop.xlane.xlu1 %294 }
 0x179   :  { %v327_v40 = vmul.f32 %v295_v27, %v1992_v34 }
 0x17b   :  { %v343_v45 = vadd.f32 1e-05, %v327_v40 }
 0x17d   :  { %1756 = vrsqrt.f32 %v343_v45  ;;  %vm428_vm9 = vweird.f32 %v343_v45 }
 0x180   :  { %v298_v49 = vpop.xlane.xlu1 %297 }
 0x181   :  { %v328_v44 = vmul.f32 %v298_v49, %v1992_v34 }
 0x183   :  { %v1757_v56 = vpop.eup %1756  ;;  %v344_v54 = vadd.f32 1e-05, %v328_v44 }
 0x184   :  { %v423_v42 = vmul.f32 %v1757_v56, %v343_v45  ;;  %vm429_vm8 = vweird.f32 %v1757_v56 }
 0x185   :  { %1758 = vrsqrt.f32 %v344_v54  ;;  %vm430_vm10 = vmor %vm428_vm9, %vm429_vm8  ;;  %vm438_vm12 = vweird.f32 %v344_v54 }
 0x186   :  { %v424_v59 = vmul.f32 %v1757_v56, %v423_v42 }
 0x187   :  { %v307_v20 = vpop.xlane.xlu0 %306 }
 0x188   :  { %v425_v4 = vmul.f32 0.5, %v424_v59  ;;  %v301_v1 = vpop.xlane.xlu2 %300  ;;  %v223_v43 = vpop.xlane.xlu1 %222  ;;  %v331_v33 = vmul.f32 %v307_v20, %v1992_v34 }
 0x189   :  { %v329_v17 = vmul.f32 %v301_v1, %v1992_v34  ;;  %v239_v18 = vmul.f32 %v223_v43, %v1992_v34 }
 0x18a   :  { %v426_v46 = vsub.f32 1.5, %v425_v4  ;;  %v2334_v19 = vadd.f32 1e-05, %v331_v33 }
 0x18b   :  { %v1759_v9 = vpop.eup %1758  ;;  %v345_v61 = vadd.f32 1e-05, %v329_v17  ;;  %v2337_v21 = vsub.f32 %v2188_v13, %v239_v18 }
 0x18c   :  { %v427_v25 = vmul.f32 %v1757_v56, %v426_v46  ;;  %v433_v50 = vmul.f32 %v1759_v9, %v344_v54  ;;  %1760 = vrsqrt.f32 %v2334_v19  ;;  %vm439_vm11 = vweird.f32 %v1759_v9 }
 0x18d   :  { %1762 = vrsqrt.f32 %v345_v61  ;;  %v271_v28 = vmul.f32 %v2337_v21, %v2337_v21  ;;  %vm440_vm13 = vmor %vm438_vm12, %vm439_vm11  ;;  %vm448_vm14 = vweird.f32 %v345_v61  ;;  %vm468_vm4 = vweird.f32 %v2334_v19 }
 0x18e   :  { %v431_v39 = vsel %vm430_vm10, %v1757_v56, %v427_v25  ;;  %v434_v52 = vmul.f32 %v1759_v9, %v433_v50 }
 0x18f   :  { %v519_v23 = vmul.f32 %v431_v39, %v2137_v11  ;;  %v317_v14 = vsel %vm81_vm0, %v271_v28, 0.0 }
 0x190   :  { %v435_v7 = vmul.f32 0.5, %v434_v52  ;;  %318 = vadd.xlane.f32.xlu1 %v317_v14  ;;  %v310_v13 = vpop.xlane.xlu1 %309  ;;  %v304_v35 = vpop.xlane.xlu2 %303 }
 0x191   :  { %v536_v30 = vmul.f32 %v2199_v15, %v519_v23  ;;  %v330_v27 = vmul.f32 %v304_v35, %v1992_v34  ;;  %v332_v11 = vmul.f32 %v310_v13, %v1992_v34 }
 0x192   :  { %v2346_v29 = vpop.eup %1760  ;;  %v436_v38 = vsub.f32 1.5, %v435_v7 }
 0x193   :  { %v553_v40 = vadd.f32 %v2218_v36, %v536_v30  ;;  %v1763_v45 = vpop.eup %1762  ;;  %v463_v44 = vmul.f32 %v2346_v29, %v2334_v19  ;;  %v346_v56 = vadd.f32 1e-05, %v330_v27  ;;  %v2354_v59 = vadd.f32 1e-05, %v332_v11 }
 0x194   :  { %v437_v48 = vmul.f32 %v1759_v9, %v436_v38  ;;  %v443_v49 = vmul.f32 %v1763_v45, %v345_v61  ;;  %vm449_vm15 = vweird.f32 %v1763_v45  ;;  %vm469_vm5 = vweird.f32 %v2346_v29 }
 0x195   :  { %v565_v51 = vpack.c.bf16 %v553_v40, %v552_v47  ;;  %1764 = vrsqrt.f32 %v346_v56  ;;  %v464_v20 = vmul.f32 %v2346_v29, %v463_v44  ;;  %vm450_vm1 = vmor %vm448_vm14, %vm449_vm15  ;;  %vm458_vm2 = vweird.f32 %v346_v56 }
 0x196   :  { %v444_v42 = vmul.f32 %v1763_v45, %v443_v49  ;;  %v441_v62 = vsel %vm440_vm13, %v1759_v9, %v437_v48  ;;  %1766 = vrsqrt.f32 %v2354_v59  ;;  %vm2392_vm7 = vmor %vm468_vm4, %vm469_vm5  ;;  %vm478_vm10 = vweird.f32 %v2354_v59 }
 0x197   :  { %1640 = vmatmul.msk.bf16.gmra.mxu1 %vm81_vm0, %v565_v51  ;;  %v520_v54 = vmul.f32 %v441_v62, %v2151_v32  ;;  %v465_v26 = vmul.f32 0.5, %v464_v20  ;;  %v680_v11 = vsel %vm81_vm0, %v1947_v8, 0.0 }
 0x198   :  { %v445_v4 = vmul.f32 0.5, %v444_v42  ;;  %v313_v1 = vpop.xlane.xlu2 %312 }
 0x199   :  { %v2358_v43 = vpop.f32.mrf.mxu1  ;;  %v333_v46 = vmul.f32 %v313_v1, %v1992_v34  ;;  %v537_v23 = vmul.f32 %v2199_v15, %v520_v54  ;;  %v466_v32 = vsub.f32 1.5, %v465_v26 }
 0x19a   :  { %v446_v33 = vsub.f32 1.5, %v445_v4 }
 0x19b   :  { %v1765_v17 = vpop.eup %1764  ;;  %v2363_v25 = vadd.f32 1e-05, %v333_v46  ;;  %v554_v38 = vadd.f32 %v2218_v36, %v537_v23 }
 0x19c   :  { %v447_v18 = vmul.f32 %v1763_v45, %v446_v33  ;;  %v453_v9 = vmul.f32 %v1765_v17, %v346_v56  ;;  %v2370_v52 = vpop.eup %1766  ;;  %vm459_vm3 = vweird.f32 %v1765_v17 }
 0x19d   :  { %1768 = vrsqrt.f32 %v2363_v25  ;;  %vm2383_vm6 = vmor %vm458_vm2, %vm459_vm3  ;;  %v473_v19 = vmul.f32 %v2370_v52, %v2354_v59  ;;  %vm488_vm8 = vweird.f32 %v2363_v25  ;;  %vm479_vm11 = vweird.f32 %v2370_v52 }
 0x19e   :  { %v451_v61 = vsel %vm450_vm1, %v1763_v45, %v447_v18  ;;  %v454_v39 = vmul.f32 %v1765_v17, %v453_v9  ;;  %v467_v45 = vmul.f32 %v2346_v29, %v466_v32  ;;  %vm480_vm13 = vmor %vm478_vm10, %vm479_vm11 }
 0x19f   :  { %v521_v50 = vmul.f32 %v451_v61, %v2196_v5  ;;  %v474_v20 = vmul.f32 %v2370_v52, %v473_v19 }
 0x1a0   :  { %v2367_v28 = vpop.xlane.xlu0 %315  ;;  %v455_v14 = vmul.f32 0.5, %v454_v39  ;;  %v84_v53 = vpop.xlane.xlu2 %83 }
 0x1a1   :  { %v2372_v7 = vpop.f32.mrf.mxu1  ;;  %v538_v13 = vmul.f32 %v2199_v15, %v521_v50  ;;  %v95_v5 = vmul.f32 %v1992_v34, %v84_v53  ;;  %v475_v9 = vmul.f32 0.5, %v474_v20 }
 0x1a2   :  { %v660_v30 = vpack.c.bf16 %v2372_v7, %v2358_v43  ;;  %v456_v35 = vsub.f32 1.5, %v455_v14 }
 0x1a3   :  { %v555_v27 = vadd.f32 %v2218_v36, %v538_v13  ;;  %v1769_v40 = vpop.eup %1768  ;;  %v2390_v47 = vsub.f32 %v2294_v31, %v95_v5  ;;  %v471_v31 = vsel %vm2392_vm7, %v2346_v29, %v467_v45 }
 0x1a4   :  { %v457_v49 = vmul.f32 %v1765_v17, %v456_v35  ;;  %v483_v44 = vmul.f32 %v1769_v40, %v2363_v25  ;;  %v523_v26 = vmul.f32 %v471_v31, %v2185_v12  ;;  %vm489_vm9 = vweird.f32 %v1769_v40 }
 0x1a5   :  { %v566_v56 = vpack.c.bf16 %v555_v27, %v554_v38  ;;  %v99_v51 = vmul.f32 %v2390_v47, %v2390_v47  ;;  %vm490_vm12 = vmor %vm488_vm8, %vm489_vm9  ;;  %v674_v27 = vsel %vm81_vm0, %v1919_v0, 0.0  ;;  %v689_v0 = vsel %vm81_vm0, %v2002_v41, 0.0 }
 0x1a6   :  { %v461_v42 = vsel %vm2383_vm6, %v1765_v17, %v457_v49  ;;  %v484_v62 = vmul.f32 %v1769_v40, %v483_v44  ;;  %v540_v32 = vmul.f32 %v2199_v15, %v523_v26  ;;  %v686_v41 = vsel %vm81_vm0, %v1982_v24, 0.0 }
 0x1a7   :  { %1641 = vmatmul.msk.bf16.gmra.mxu1 %vm81_vm0, %v566_v56  ;;  %v101_v33 = vsel %vm81_vm0, %v99_v51, 0.0  ;;  %v522_v46 = vmul.f32 %v461_v42, %v2236_v57  ;;  %v671_v57 = vsel %vm81_vm0, %v1954_v10, 0.0 }
 0x1a8   :  { %v87_v4 = vpop.xlane.xlu0 %86  ;;  %102 = vadd.xlane.f32.xlu1 %v101_v33  ;;  %v485_v17 = vmul.f32 0.5, %v484_v62  ;;  %v557_v25 = vadd.f32 %v2218_v36, %v540_v32 }
 0x1a9   :  { %v96_v1 = vmul.f32 %v1992_v34, %v87_v4  ;;  %v2409_v54 = vpop.f32.mrf.mxu1  ;;  %v539_v61 = vmul.f32 %v2199_v15, %v522_v46 }
 0x1aa   :  { %v486_v50 = vsub.f32 1.5, %v485_v17 }
 0x1ab   :  { %v2412_v18 = vsub.f32 %v2311_v22, %v96_v1  ;;  %v476_v22 = vsub.f32 1.5, %v475_v9  ;;  %v556_v53 = vadd.f32 %v2218_v36, %v539_v61 }
 0x1ac   :  { %v487_v10 = vmul.f32 %v1769_v40, %v486_v50 }
 0x1ad   :  { %v100_v29 = vmul.f32 %v2412_v18, %v2412_v18  ;;  %v477_v35 = vmul.f32 %v2370_v52, %v476_v22  ;;  %v567_v38 = vpack.c.bf16 %v557_v25, %v556_v53 }
 0x1ae   :  { %v491_v45 = vsel %vm490_vm12, %v1769_v40, %v487_v10  ;;  %v683_v40 = vsel %vm81_vm0, %v1968_v16, 0.0 }
 0x1af   :  { %v104_v39 = vsel %vm81_vm0, %v100_v29, 0.0  ;;  %v481_v19 = vsel %vm480_vm13, %v2370_v52, %v477_v35  ;;  %v525_v48 = vmul.f32 %v491_v45, %v2272_v37  ;;  %v692_v37 = vsel %vm81_vm0, %v2034_v60, 0.0 }
 0x1b0   :  { %v670_v23 = vpop.xlane.xlu0 %669  ;;  %105 = vadd.xlane.f32.xlu2 %v104_v39  ;;  %672 = vadd.xlane.f32.xlu1 %v671_v57  ;;  %v524_v49 = vmul.f32 %v481_v19, %v2231_v55  ;;  %v334_v60 = vmul.f32 %v2367_v28, %v1992_v34 }
 0x1b1   :  { %v716_v12 = vmul.f32 %v670_v23, %v1992_v34  ;;  %v2425_v14 = vpop.f32.mrf.mxu1  ;;  %v542_v44 = vmul.f32 %v2199_v15, %v525_v48 }
 0x1b2   :  { %v661_v5 = vpack.c.bf16 %v2425_v14, %v2409_v54  ;;  %v541_v8 = vmul.f32 %v2199_v15, %v524_v49  ;;  %v350_v24 = vadd.f32 1e-05, %v334_v60  ;;  %v1164_v54 = vsel %vm81_vm0, %v660_v30, 0 }
 0x1b3   :  { %v2430_v13 = vsub.f32 %v1927_v2, %v716_v12  ;;  %v559_v52 = vadd.f32 %v2218_v36, %v542_v44 }
 0x1b4   :  { %v558_v56 = vadd.f32 %v2218_v36, %v541_v8  ;;  %1770 = vrsqrt.f32 %v350_v24  ;;  %vm498_vm14 = vweird.f32 %v350_v24 }
 0x1b5   :  { %v748_v59 = vmul.f32 %v2430_v13, %v2430_v13 }
 0x1b6   :  { %v568_v55 = vpack.c.bf16 %v559_v52, %v558_v56  ;;  %v1834_v56 = vld [vmem:[%s3041_s1 + $0x8] sm:$0xff] }
 0x1b7   :  { %v764_v2 = vsel %vm81_vm0, %v748_v59, 0.0  ;;  %1642 = vmatmul.msk.bf16.gmra.mxu1 %vm81_vm0, %v567_v38 }
 0x1b8   :  { %765 = vadd.xlane.f32.xlu0 %v764_v2  ;;  %675 = vadd.xlane.f32.xlu2 %v674_v27  ;;  %v679_v16 = vpop.xlane.xlu0 %678 }
 0x1b9   :  { %681 = vadd.xlane.f32.xlu1 %v680_v11  ;;  %v719_v51 = vmul.f32 %v679_v16, %v1992_v34  ;;  %v2469_v1 = vpop.f32.mrf.mxu1 }
 0x1ba   :  { %v1771_v31 = vpop.eup %1770 }
 0x1bb   :  { %v2462_v42 = vsub.f32 %v1939_v6, %v719_v51  ;;  %v493_v20 = vmul.f32 %v1771_v31, %v350_v24  ;;  %vm499_vm15 = vweird.f32 %v1771_v31 }
 0x1bc   :  { %vm500_vm1 = vmor %vm498_vm14, %vm499_vm15 }
 0x1bd   :  { %v751_v62 = vmul.f32 %v2462_v42, %v2462_v42  ;;  %v494_v33 = vmul.f32 %v1771_v31, %v493_v20 }
 0x1bf   :  { %v773_v4 = vsel %vm81_vm0, %v751_v62, 0.0  ;;  %v495_v26 = vmul.f32 0.5, %v494_v33 }
 0x1c0   :  { %690 = vadd.xlane.f32.xlu0 %v689_v0  ;;  %684 = vadd.xlane.f32.xlu2 %v683_v40 }
 0x1c1   :  { %v496_v9 = vsub.f32 1.5, %v495_v26  ;;  %v2472_v29 = vpop.f32.mrf.mxu1  ;;  %v1835_v26 = vld [vmem:[%s3041_s1 + $0x10] sm:$0xff] }
 0x1c3   :  { %v497_v28 = vmul.f32 %v1771_v31, %v496_v9 }
 0x1c5   :  { %v501_v57 = vsel %vm500_vm1, %v1771_v31, %v497_v28 }
 0x1c6   :  { %v526_v12 = vmul.f32 %v501_v57, %v2292_v63 }
 0x1c7   :  { %1643 = vmatmul.msk.bf16.gmra.mxu1 %vm81_vm0, %v568_v55 }
 0x1c8   :  { %693 = vadd.xlane.f32.xlu0 %v692_v37  ;;  %687 = vadd.xlane.f32.xlu2 %v686_v41  ;;  %v543_v35 = vmul.f32 %v2199_v15, %v526_v12 }
 0x1ca   :  { %v560_v63 = vadd.f32 %v2218_v36, %v543_v35 }
 0x1d0   :  { %774 = vadd.xlane.f32.xlu2 %v773_v4 }
 0x203   :  { %v319_v46 = vpop.xlane.xlu1 %318 }
 0x204   :  { %v335_v6 = vmul.f32 %v319_v46, %v1992_v34 }
 0x206   :  { %v351_v17 = vadd.f32 1e-05, %v335_v6 }
 0x208   :  { %1772 = vrsqrt.f32 %v351_v17  ;;  %vm508_vm3 = vweird.f32 %v351_v17 }
 0x20e   :  { %v1773_v61 = vpop.eup %1772 }
 0x20f   :  { %v503_v50 = vmul.f32 %v1773_v61, %v351_v17  ;;  %vm509_vm2 = vweird.f32 %v1773_v61 }
 0x210   :  { %vm510_vm4 = vmor %vm508_vm3, %vm509_vm2 }
 0x211   :  { %v504_v39 = vmul.f32 %v1773_v61, %v503_v50 }
 0x213   :  { %v505_v23 = vmul.f32 0.5, %v504_v39 }
 0x214   :  { %v2474_v32 = vpop.f32.mrf.mxu1 }
 0x215   :  { %v506_v22 = vsub.f32 1.5, %v505_v23 }
 0x217   :  { %v507_v53 = vmul.f32 %v1773_v61, %v506_v22 }
 0x219   :  { %v511_v10 = vsel %vm510_vm4, %v1773_v61, %v507_v53  ;;  %v1836_v61 = vld [vmem:[%s3041_s1 + $0x20] sm:$0xff] }
 0x21a   :  { %v527_v25 = vmul.f32 %v511_v10, %v2337_v21  ;;  %v1723_v21 = vld [vmem:[%s3045_s5 + $0x8] sm:$0xff] }
 0x21b   :  { %v103_v59 = vpop.xlane.xlu1 %102  ;;  %167 = vmatpush.bf16.msra.mxu0 %v1723_v21 }
 0x21c   :  { %v2479_v38 = vpop.f32.mrf.mxu1  ;;  %v544_v27 = vmul.f32 %v2199_v15, %v527_v25  ;;  %v107_v45 = vmul.f32 %v103_v59, %v1992_v34  ;;  %v1722_v15 = vld [vmem:[%s3045_s5] sm:$0xff] }
 0x21d   :  { %v663_v2 = vpack.c.bf16 %v2479_v38, %v2474_v32 }
 0x21e   :  { %v561_v11 = vadd.f32 %v2218_v36, %v544_v27  ;;  %v109_v19 = vadd.f32 1e-05, %v107_v45  ;;  %v133_v27 = vperm.slane %v2177_v58, 0 }
 0x21f   :  { %168 = vmatpush.bf16.msra.mxu0 %v1722_v15 }
 0x220   :  { %v569_v48 = vpack.c.bf16 %v561_v11, %v560_v63  ;;  %1774 = vrsqrt.f32 %v109_v19  ;;  %vm117_vm5 = vweird.f32 %v109_v19 }
 0x222   :  { %1644 = vmatmul.msk.bf16.gmra.mxu1 %vm81_vm0, %v569_v48 }
 0x223   :  { %v106_v49 = vpop.xlane.xlu2 %105  ;;  %v673_v40 = vpop.xlane.xlu1 %672 }
 0x224   :  { %v108_v0 = vmul.f32 %v106_v49, %v1992_v34  ;;  %v2495_v44 = vpop.f32.mrf.mxu1  ;;  %v717_v36 = vmul.f32 %v673_v40, %v1992_v34 }
 0x226   :  { %v110_v8 = vadd.f32 1e-05, %v108_v0  ;;  %v1775_v52 = vpop.eup %1774  ;;  %v2501_v37 = vsub.f32 %v1834_v56, %v717_v36  ;;  %v2545_v36 = vld [vmem:[%s3041_s1 + $0x58] sm:$0xff] }
 0x227   :  { %v112_v55 = vmul.f32 %v1775_v52, %v109_v19  ;;  %vm118_vm6 = vweird.f32 %v1775_v52  ;;  %v1837_v19 = vld [vmem:[%s3041_s1 + $0x28] sm:$0xff] }
 0x228   :  { %1776 = vrsqrt.f32 %v110_v8  ;;  %v749_v41 = vmul.f32 %v2501_v37, %v2501_v37  ;;  %vm119_vm7 = vmor %vm117_vm5, %vm118_vm6  ;;  %vm127_vm8 = vweird.f32 %v110_v8 }
 0x229   :  { %v113_v16 = vmul.f32 %v1775_v52, %v112_v55 }
 0x22a   :  { %v767_v51 = vsel %vm81_vm0, %v749_v41, 0.0 }
 0x22b   :  { %v676_v62 = vpop.xlane.xlu2 %675  ;;  %v114_v4 = vmul.f32 0.5, %v113_v16  ;;  %768 = vadd.xlane.f32.xlu1 %v767_v51  ;;  %v2522_v57 = vpop.xlane.xlu0 %765 }
 0x22c   :  { %v682_v60 = vpop.xlane.xlu1 %681  ;;  %v718_v24 = vmul.f32 %v676_v62, %v1992_v34  ;;  %v2507_v31 = vpop.f32.mrf.mxu1 }
 0x22d   :  { %v720_v33 = vmul.f32 %v682_v60, %v1992_v34  ;;  %v664_v46 = vpack.c.bf16 %v2507_v31, %v2495_v44  ;;  %v115_v6 = vsub.f32 1.5, %v114_v4  ;;  %v1840_v4 = vld [vmem:[%s3041_s1 + $0x30] sm:$0xff] }
 0x22e   :  { %v1777_v20 = vpop.eup %1776  ;;  %v2515_v9 = vsub.f32 %v1835_v26, %v718_v24  ;;  %v2574_v26 = vld [vmem:[%s3041_s1 + $0x60] sm:$0xff] }
 0x22f   :  { %v122_v17 = vmul.f32 %v1777_v20, %v110_v8  ;;  %v2520_v28 = vsub.f32 %v1836_v61, %v720_v33  ;;  %v116_v50 = vmul.f32 %v1775_v52, %v115_v6  ;;  %vm128_vm9 = vweird.f32 %v1777_v20  ;;  %v1841_v6 = vld [vmem:[%s3041_s1 + $0x38] sm:$0xff] }
 0x230   :  { %v750_v23 = vmul.f32 %v2515_v9, %v2515_v9  ;;  %vm129_vm10 = vmor %vm127_vm8, %vm128_vm9  ;;  %v701_v8 = vsel %vm81_vm0, %v2545_v36, 0.0  ;;  %v704_v61 = vsel %vm81_vm0, %v2574_v26, 0.0 }
 0x231   :  { %v123_v39 = vmul.f32 %v1777_v20, %v122_v17  ;;  %v752_v22 = vmul.f32 %v2520_v28, %v2520_v28  ;;  %v120_v12 = vsel %vm119_vm7, %v1775_v52, %v116_v50  ;;  %v2552_v52 = vld [vmem:[%s3041_s1 + $0x48] sm:$0xff]  ;;  %v2581_v50 = vld [vmem:[%s3041_s1 + $0x50] sm:$0xff] }
 0x232   :  { %v770_v10 = vsel %vm81_vm0, %v750_v23, 0.0  ;;  %v131_v25 = vmul.f32 %v120_v12, %v2390_v47  ;;  %v136_v47 = vperm.slane %v2177_v58, 5  ;;  %v695_v58 = vsel %vm81_vm0, %v2552_v52, 0.0 }
 0x233   :  { %v124_v53 = vmul.f32 0.5, %v123_v39  ;;  %v776_v35 = vsel %vm81_vm0, %v752_v22, 0.0  ;;  %v685_v59 = vpop.xlane.xlu2 %684  ;;  %771 = vadd.xlane.f32.xlu1 %v770_v10  ;;  %v691_v0 = vpop.xlane.xlu0 %690  ;;  %v698_v39 = vsel %vm81_vm0, %v2581_v50, 0.0 }
 0x234   :  { %777 = vadd.xlane.f32.xlu2 %v776_v35  ;;  %v721_v63 = vmul.f32 %v685_v59, %v1992_v34  ;;  %v134_v48 = vmul.f32 %v133_v27, %v131_v25  ;;  %v723_v51 = vmul.f32 %v691_v0, %v1992_v34  ;;  %v2593_v25 = vld [vmem:[%s3041_s1 + $0x68] sm:$0xff]  ;;  %v1845_v59 = vld [vmem:[%s3041_s1 + $0x40] sm:$0xff]  ;;  %v812_v0 = vmul.f32 %v2522_v57, %v1992_v34 }
 0x235   :  { %v125_v45 = vsub.f32 1.5, %v124_v53  ;;  %v707_v35 = vsel %vm81_vm0, %v2593_v25, 0.0 }
 0x236   :  { %v2536_v21 = vsub.f32 %v1837_v19, %v721_v63  ;;  %v137_v41 = vadd.f32 %v136_v47, %v134_v48  ;;  %v2569_v17 = vsub.f32 %v1841_v6, %v723_v51 }
 0x237   :  { %v126_v11 = vmul.f32 %v1777_v20, %v125_v45 }
 0x238   :  { %v753_v49 = vmul.f32 %v2536_v21, %v2536_v21  ;;  %v139_v24 = vmul.f32 0.17677669, %v137_v41  ;;  %v755_v10 = vmul.f32 %v2569_v17, %v2569_v17  ;;  %v1726_v41 = vld [vmem:[%s3045_s5 + $0x20] sm:$0xff] }
 0x239   :  { %v130_v15 = vsel %vm129_vm10, %v1777_v20, %v126_v11  ;;  %v2608_v11 = vld [vmem:[%s3041_s1 + $0x70] sm:$0xff] }
 0x23a   :  { %v132_v40 = vmul.f32 %v130_v15, %v2412_v18  ;;  %v779_v56 = vsel %vm81_vm0, %v753_v49, 0.0  ;;  %v785_v45 = vsel %vm81_vm0, %v755_v10, 0.0  ;;  %v710_v19 = vsel %vm81_vm0, %v2608_v11, 0.0  ;;  %v2615_v15 = vpop.f32.mrf.mxu1 }
 0x23b   :  { %780 = vadd.xlane.f32.xlu0 %v779_v56  ;;  %v688_v18 = vpop.xlane.xlu2 %687  ;;  %696 = vadd.xlane.f32.xlu1 %v695_v58  ;;  %v694_v12 = vpop.xlane.xlu0 %693 }
 0x23c   :  { %v135_v55 = vmul.f32 %v133_v27, %v132_v40  ;;  %702 = vadd.xlane.f32.xlu2 %v701_v8  ;;  %v722_v16 = vmul.f32 %v688_v18, %v1992_v34  ;;  %v724_v53 = vmul.f32 %v694_v12, %v1992_v34  ;;  %v828_v8 = vadd.f32 1e-05, %v812_v0  ;;  %v1727_v18 = vld [vmem:[%s3045_s5 + $0x28] sm:$0xff] }
 0x23d   :  { %1109 = vmatpush.bf16.msra.mxu2 %v1727_v18 }
 0x23e   :  { %v138_v62 = vadd.f32 %v136_v47, %v135_v55  ;;  %v2562_v60 = vsub.f32 %v1840_v4, %v722_v16  ;;  %v2600_v27 = vsub.f32 %v1845_v59, %v724_v53  ;;  %v713_v47 = vsel %vm81_vm0, %v2163_v3, 0.0 }
 0x23f   :  { %1778 = vrsqrt.f32 %v828_v8  ;;  %vm850_vm11 = vweird.f32 %v828_v8 }
 0x240   :  { %v140_v20 = vmul.f32 0.17677669, %v138_v62  ;;  %v754_v33 = vmul.f32 %v2562_v60, %v2562_v60  ;;  %v756_v63 = vmul.f32 %v2600_v27, %v2600_v27 }
 0x241   :  { %1110 = vmatpush.bf16.msra.mxu2 %v1726_v41 }
 0x242   :  { %v141_v23 = vpack.c.bf16 %v140_v20, %v139_v24  ;;  %v782_v22 = vsel %vm81_vm0, %v754_v33, 0.0  ;;  %v788_v48 = vsel %vm81_vm0, %v756_v63, 0.0  ;;  %v2617_v49 = vpop.f32.mrf.mxu1 }
 0x243   :  { %783 = vadd.xlane.f32.xlu0 %v782_v22  ;;  %699 = vadd.xlane.f32.xlu1 %v698_v39  ;;  %v775_v56 = vpop.xlane.xlu2 %774 }
 0x244   :  { %1624 = vmatmul.msk.bf16.vlgmr.msra.gmra.mxu0 %vm81_vm0, %v141_v23  ;;  %705 = vadd.xlane.f32.xlu2 %v704_v61  ;;  %v815_v3 = vmul.f32 %v775_v56, %v1992_v34 }
 0x245   :  { %v1779_v55 = vpop.eup %1778 }
 0x246   :  { %v845_v16 = vmul.f32 %v1779_v55, %v828_v8  ;;  %v2630_v57 = vadd.f32 1e-05, %v815_v3  ;;  %vm851_vm12 = vweird.f32 %v1779_v55 }
 0x247   :  { %vm2644_vm13 = vmor %vm850_vm11, %vm851_vm12 }
 0x248   :  { %v846_v24 = vmul.f32 %v1779_v55, %v845_v16  ;;  %1780 = vrsqrt.f32 %v2630_v57  ;;  %vm880_vm4 = vweird.f32 %v2630_v57 }
 0x24a   :  { %v2621_v40 = vpop.f32.mrf.mxu1  ;;  %v847_v33 = vmul.f32 0.5, %v846_v24 }
 0x24b   :  { %708 = vadd.xlane.f32.xlu0 %v707_v35  ;;  %786 = vadd.xlane.f32.xlu1 %v785_v45 }
 0x24c   :  { %v848_v12 = vsub.f32 1.5, %v847_v33 }
 0x24e   :  { %v2635_v22 = vpop.eup %1780 }
 0x24f   :  { %vm881_vm5 = vweird.f32 %v2635_v22 }
 0x250   :  { %vm2736_vm7 = vmor %vm880_vm4, %vm881_vm5 }
 0x252   :  { %v652_v58 = vpop.f32.mrf.mxu1 }
 0x253   :  { %711 = vadd.xlane.f32.xlu0 %v710_v19  ;;  %789 = vadd.xlane.f32.xlu1 %v788_v48  ;;  %v849_v19 = vmul.f32 %v1779_v55, %v848_v12  ;;  %v875_v48 = vmul.f32 %v2635_v22, %v2630_v57  ;;  %v666_v8 = vpack.c.bf16 %v652_v58, %v2621_v40 }
 0x255   :  { %v853_v24 = vsel %vm2644_vm13, %v1779_v55, %v849_v19  ;;  %v876_v33 = vmul.f32 %v2635_v22, %v875_v48  ;;  %v1182_v12 = vsel %vm81_vm0, %v666_v8, 0  ;;  %v665_v48 = vpack.c.bf16 %v2617_v49, %v2615_v15 }
 0x25b   :  { %714 = vadd.xlane.f32.xlu1 %v713_v47 }
 0x29e   :  { %v769_v51 = vpop.xlane.xlu1 %768 }
 0x29f   :  { %v655_v62 = vpop.f32.mrf.mxu1  ;;  %v813_v4 = vmul.f32 %v769_v51, %v1992_v34 }
 0x2a1   :  { %v829_v20 = vadd.f32 1e-05, %v813_v4 }
 0x2a3   :  { %1782 = vrsqrt.f32 %v829_v20  ;;  %vm860_vm14 = vweird.f32 %v829_v20 }
 0x2a6   :  { %v772_v6 = vpop.xlane.xlu1 %771 }
 0x2a7   :  { %v778_v61 = vpop.xlane.xlu2 %777  ;;  %v814_v39 = vmul.f32 %v772_v6, %v1992_v34  ;;  %v657_v23 = vpop.f32.mrf.mxu1 }
 0x2a8   :  { %v667_v53 = vpack.c.bf16 %v657_v23, %v655_v62  ;;  %v816_v63 = vmul.f32 %v778_v61, %v1992_v34 }
 0x2a9   :  { %v1783_v10 = vpop.eup %1782  ;;  %v2637_v35 = vadd.f32 1e-05, %v814_v39 }
 0x2aa   :  { %v855_v59 = vmul.f32 %v1783_v10, %v829_v20  ;;  %v1185_v45 = vsel %vm81_vm0, %v667_v53, 0  ;;  %vm861_vm15 = vweird.f32 %v1783_v10  ;;  %v2650_v51 = vadd.f32 1e-05, %v816_v63 }
 0x2ab   :  { %1784 = vrsqrt.f32 %v2637_v35  ;;  %1187 = vmatpush.bf16.xpose.msra.mxu3 %v1185_v45  ;;  %vm2661_vm1 = vmor %vm860_vm14, %vm861_vm15  ;;  %v1004_v53 = vmul.f32 %v853_v24, %v2430_v13  ;;  %v877_v45 = vmul.f32 0.5, %v876_v33  ;;  %vm870_vm2 = vweird.f32 %v2637_v35 }
 0x2ac   :  { %v856_v47 = vmul.f32 %v1783_v10, %v855_v59  ;;  %vm890_vm10 = vweird.f32 %v2650_v51 }
 0x2ae   :  { %v781_v56 = vpop.xlane.xlu0 %780  ;;  %v857_v18 = vmul.f32 0.5, %v856_v47  ;;  %v697_v3 = vpop.xlane.xlu1 %696 }
 0x2af   :  { %v817_v41 = vmul.f32 %v781_v56, %v1992_v34  ;;  %v703_v16 = vpop.xlane.xlu2 %702  ;;  %v725_v62 = vmul.f32 %v697_v3, %v1992_v34 }
 0x2b0   :  { %v727_v4 = vmul.f32 %v703_v16, %v1992_v34  ;;  %v858_v40 = vsub.f32 1.5, %v857_v18 }
 0x2b1   :  { %v2657_v58 = vadd.f32 1e-05, %v817_v41  ;;  %v2659_v20 = vpop.eup %1784  ;;  %v2666_v61 = vsub.f32 %v2552_v52, %v725_v62 }
 0x2b2   :  { %v2669_v39 = vsub.f32 %v2545_v36, %v727_v4  ;;  %v859_v23 = vmul.f32 %v1783_v10, %v858_v40  ;;  %v865_v55 = vmul.f32 %v2659_v20, %v2637_v35  ;;  %v2682_v36 = vld [vmem:[%s3044_s4] sm:$0xff]  ;;  %v878_v4 = vsub.f32 1.5, %v877_v45 }
 0x2b3   :  { %1786 = vrsqrt.f32 %v2657_v58  ;;  %1188 = vmatpush.bf16.xpose.msra.mxu3 %v1182_v12  ;;  %v757_v52 = vmul.f32 %v2666_v61, %v2666_v61  ;;  %v2685_v59 = vperm.slane %v2682_v36, 2  ;;  %vm871_vm3 = vweird.f32 %v2659_v20 }
 0x2b4   :  { %1788 = vrsqrt.f32 %v2650_v51  ;;  %v863_v63 = vsel %vm2661_vm1, %v1783_v10, %v859_v23  ;;  %v866_v13 = vmul.f32 %v2659_v20, %v865_v55  ;;  %v759_v19 = vmul.f32 %v2669_v39, %v2669_v39  ;;  %vm2723_vm6 = vmor %vm870_vm2, %vm871_vm3 }
 0x2b5   :  { %v1005_v47 = vmul.f32 %v863_v63, %v2501_v37  ;;  %v791_v0 = vsel %vm81_vm0, %v757_v52, 0.0  ;;  %v2698_v10 = vperm.slane %v2682_v36, 7  ;;  %v1021_v15 = vmul.f32 %v2685_v59, %v1004_v53 }
 0x2b6   :  { %v784_v8 = vpop.xlane.xlu0 %783  ;;  %v867_v56 = vmul.f32 0.5, %v866_v13  ;;  %792 = vadd.xlane.f32.xlu2 %v791_v0  ;;  %v700_v18 = vpop.xlane.xlu1 %699  ;;  %v797_v3 = vsel %vm81_vm0, %v759_v19, 0.0  ;;  %v1179_v55 = vsel %vm81_vm0, %v665_v48, 0  ;;  %v879_v57 = vmul.f32 %v2635_v22, %v878_v4 }
 0x2b7   :  { %v706_v41 = vpop.xlane.xlu2 %705  ;;  %v726_v16 = vmul.f32 %v700_v18, %v1992_v34  ;;  %798 = vadd.xlane.f32.xlu0 %v797_v3  ;;  %v1022_v37 = vmul.f32 %v2685_v59, %v1005_v47  ;;  %v818_v23 = vmul.f32 %v784_v8, %v1992_v34  ;;  %vm900_vm8 = vweird.f32 %v2657_v58 }
 0x2b8   :  { %v728_v62 = vmul.f32 %v706_v41, %v1992_v34  ;;  %v868_v24 = vsub.f32 1.5, %v867_v56 }
 0x2b9   :  { %v2704_v49 = vpop.eup %1786  ;;  %v2713_v6 = vsub.f32 %v2581_v50, %v726_v16  ;;  %v1038_v50 = vadd.f32 %v2698_v10, %v1021_v15  ;;  %v1039_v52 = vadd.f32 %v2698_v10, %v1022_v37  ;;  %v2741_v48 = vadd.f32 1e-05, %v818_v23 }
 0x2ba   :  { %v2708_v33 = vpop.eup %1788  ;;  %v895_v40 = vmul.f32 %v2704_v49, %v2657_v58  ;;  %v869_v35 = vmul.f32 %v2659_v20, %v868_v24  ;;  %v2721_v12 = vsub.f32 %v2574_v26, %v728_v62  ;;  %v883_v62 = vsel %vm2736_vm7, %v2635_v22, %v879_v57 }
 0x2bb   :  { %1189 = vmatpush.bf16.xpose.msra.mxu3 %v1179_v55  ;;  %v758_v45 = vmul.f32 %v2713_v6, %v2713_v6  ;;  %v885_v63 = vmul.f32 %v2708_v33, %v2650_v51  ;;  %v1054_v47 = vpack.c.bf16 %v1039_v52, %v1038_v50  ;;  %1790 = vrsqrt.f32 %v2741_v48 }
 0x2bc   :  { %v760_v26 = vmul.f32 %v2721_v12, %v2721_v12  ;;  %v896_v19 = vmul.f32 %v2704_v49, %v895_v40  ;;  %v873_v8 = vsel %vm2723_vm6, %v2659_v20, %v869_v35  ;;  %v1176_v40 = vsel %vm81_vm0, %v664_v46, 0 }
 0x2bd   :  { %v794_v56 = vsel %vm81_vm0, %v758_v45, 0.0  ;;  %1657 = vmatmul.msk.bf16.vlgmr.msra.gmra.mxu2 %vm81_vm0, %v1054_v47  ;;  %v886_v15 = vmul.f32 %v2708_v33, %v885_v63  ;;  %v1006_v37 = vmul.f32 %v873_v8, %v2515_v9  ;;  %v1007_v23 = vmul.f32 %v883_v62, %v2462_v42 }
 0x2be   :  { %v709_v0 = vpop.xlane.xlu0 %708  ;;  %v787_v18 = vpop.xlane.xlu1 %786  ;;  %v800_v41 = vsel %vm81_vm0, %v760_v26, 0.0  ;;  %795 = vadd.xlane.f32.xlu2 %v794_v56  ;;  %v897_v24 = vmul.f32 0.5, %v896_v19  ;;  %vm901_vm9 = vweird.f32 %v2704_v49  ;;  %v1173_v57 = vsel %vm81_vm0, %v663_v2, 0 }
 0x2bf   :  { %v729_v3 = vmul.f32 %v709_v0, %v1992_v34  ;;  %v819_v16 = vmul.f32 %v787_v18, %v1992_v34  ;;  %801 = vadd.xlane.f32.xlu1 %v800_v41  ;;  %v1023_v35 = vmul.f32 %v2685_v59, %v1006_v37  ;;  %v1024_v31 = vmul.f32 %v2685_v59, %v1007_v23  ;;  %vm2794_vm12 = vmor %vm900_vm8, %vm901_vm9 }
 0x2c0   :  { %v898_v53 = vsub.f32 1.5, %v897_v24  ;;  %vm891_vm11 = vweird.f32 %v2708_v33  ;;  %v662_v0 = vpack.c.bf16 %v2472_v29, %v2469_v1  ;;  %v1848_v1 = vld [vmem:[%s3041_s1 + $0x78] sm:$0xff]  ;;  %vm910_vm1 = vweird.f32 %v2741_v48 }
 0x2c1   :  { %v2756_v20 = vsub.f32 %v2593_v25, %v729_v3  ;;  %v2759_v4 = vadd.f32 1e-05, %v819_v16  ;;  %v887_v25 = vmul.f32 0.5, %v886_v15  ;;  %v2776_v46 = vpop.eup %1790  ;;  %v1040_v63 = vadd.f32 %v2698_v10, %v1023_v35  ;;  %vm2803_vm13 = vmor %vm890_vm10, %vm891_vm11  ;;  %v170_v35 = vpop.f32.mrf.mxu0 }
 0x2c2   :  { %v899_v26 = vmul.f32 %v2704_v49, %v898_v53  ;;  %v1041_v32 = vadd.f32 %v2698_v10, %v1024_v31  ;;  %v905_v2 = vmul.f32 %v2776_v46, %v2741_v48  ;;  %v1170_v15 = vsel %vm81_vm0, %v662_v0, 0 }
 0x2c3   :  { %v761_v22 = vmul.f32 %v2756_v20, %v2756_v20  ;;  %1792 = vrsqrt.f32 %v2759_v4  ;;  %1190 = vmatpush.bf16.xpose.msra.mxu3 %v1176_v40  ;;  %v888_v42 = vsub.f32 1.5, %v887_v25  ;;  %vm920_vm14 = vweird.f32 %v2759_v4 }
 0x2c4   :  { %v1055_v47 = vpack.c.bf16 %v1041_v32, %v1040_v63  ;;  %v903_v8 = vsel %vm2794_vm12, %v2704_v49, %v899_v26  ;;  %v906_v16 = vmul.f32 %v2776_v46, %v905_v2  ;;  %vm911_vm2 = vweird.f32 %v2776_v46 }
 0x2c5   :  { %v803_v9 = vsel %vm81_vm0, %v761_v22, 0.0  ;;  %v889_v38 = vmul.f32 %v2708_v33, %v888_v42  ;;  %v1009_v62 = vmul.f32 %v903_v8, %v2536_v21  ;;  %vm912_vm4 = vmor %vm910_vm1, %vm911_vm2 }
 0x2c6   :  { %v712_v55 = vpop.xlane.xlu0 %711  ;;  %v2772_v50 = vpop.xlane.xlu1 %789  ;;  %804 = vadd.xlane.f32.xlu2 %v803_v9 }
 0x2c7   :  { %v730_v44 = vmul.f32 %v712_v55, %v1992_v34  ;;  %v893_v41 = vsel %vm2803_vm13, %v2708_v33, %v889_v38  ;;  %v907_v33 = vmul.f32 0.5, %v906_v16  ;;  %v1026_v21 = vmul.f32 %v2685_v59, %v1009_v62 }
 0x2c8   :  { %v1008_v37 = vmul.f32 %v893_v41, %v2520_v28  ;;  %v1167_v55 = vsel %vm81_vm0, %v661_v5, 0  ;;  %v820_v43 = vmul.f32 %v2772_v50, %v1992_v34 }
 0x2c9   :  { %v2781_v52 = vsub.f32 %v2608_v11, %v730_v44  ;;  %v1793_v45 = vpop.eup %1792  ;;  %v908_v25 = vsub.f32 1.5, %v907_v33  ;;  %v1043_v9 = vadd.f32 %v2698_v10, %v1026_v21  ;;  %v172_v5 = vpop.f32.mrf.mxu0 }
 0x2ca   :  { %v915_v58 = vmul.f32 %v1793_v45, %v2759_v4  ;;  %v1025_v23 = vmul.f32 %v2685_v59, %v1008_v37  ;;  %vm921_vm15 = vweird.f32 %v1793_v45  ;;  %v836_v7 = vadd.f32 1e-05, %v820_v43 }
 0x2cb   :  { %v762_v11 = vmul.f32 %v2781_v52, %v2781_v52  ;;  %1191 = vmatpush.bf16.xpose.msra.mxu3 %v1173_v57  ;;  %vm922_vm3 = vmor %vm920_vm14, %vm921_vm15  ;;  %v909_v4 = vmul.f32 %v2776_v46, %v908_v25 }
 0x2cc   :  { %v916_v56 = vmul.f32 %v1793_v45, %v915_v58  ;;  %v1042_v53 = vadd.f32 %v2698_v10, %v1025_v23  ;;  %1794 = vrsqrt.f32 %v836_v7  ;;  %vm930_vm5 = vweird.f32 %v836_v7 }
 0x2cd   :  { %v806_v51 = vsel %vm81_vm0, %v762_v11, 0.0  ;;  %1658 = vmatmul.msk.bf16.gmra.mxu2 %vm81_vm0, %v1055_v47  ;;  %v913_v48 = vsel %vm912_vm4, %v2776_v46, %v909_v4 }
 0x2ce   :  { %807 = vadd.xlane.f32.xlu0 %v806_v51  ;;  %v715_v18 = vpop.xlane.xlu1 %714  ;;  %v917_v49 = vmul.f32 0.5, %v916_v56  ;;  %v1056_v44 = vpack.c.bf16 %v1043_v9, %v1042_v53  ;;  %v1010_v14 = vmul.f32 %v913_v48, %v2562_v60 }
 0x2cf   :  { %v731_v3 = vmul.f32 %v715_v18, %v1992_v34 }
 0x2d0   :  { %v918_v22 = vsub.f32 1.5, %v917_v49  ;;  %v1027_v63 = vmul.f32 %v2685_v59, %v1010_v14 }
 0x2d1   :  { %v2822_v29 = vsub.f32 %v1848_v1, %v731_v3 }
 0x2d2   :  { %v919_v28 = vmul.f32 %v1793_v45, %v918_v22  ;;  %v1795_v30 = vpop.eup %1794 }
 0x2d3   :  { %1192 = vmatpush.bf16.xpose.msra.mxu3 %v1170_v15  ;;  %v763_v24 = vmul.f32 %v2822_v29, %v2822_v29  ;;  %v925_v60 = vmul.f32 %v1795_v30, %v836_v7  ;;  %vm931_vm6 = vweird.f32 %v1795_v30 }
 0x2d4   :  { %v923_v31 = vsel %vm922_vm3, %v1793_v45, %v919_v28  ;;  %v175_v45 = vpack.c.bf16 %v172_v5, %v170_v35  ;;  %vm932_vm7 = vmor %vm930_vm5, %vm931_vm6 }
 0x2d5   :  { %v809_v40 = vsel %vm81_vm0, %v763_v24, 0.0  ;;  %v1011_v42 = vmul.f32 %v923_v31, %v2569_v17  ;;  %v1044_v17 = vadd.f32 %v2698_v10, %v1027_v63  ;;  %v926_v58 = vmul.f32 %v1795_v30, %v925_v60 }
 0x2d6   :  { %810 = vadd.xlane.f32.xlu1 %v809_v40 }
 0x2d7   :  { %v1028_v57 = vmul.f32 %v2685_v59, %v1011_v42  ;;  %v927_v2 = vmul.f32 0.5, %v926_v58 }
 0x2d9   :  { %v1045_v26 = vadd.f32 %v2698_v10, %v1028_v57  ;;  %v928_v47 = vsub.f32 1.5, %v927_v2 }
 0x2db   :  { %1193 = vmatpush.bf16.xpose.msra.mxu3 %v1167_v55  ;;  %v1057_v46 = vpack.c.bf16 %v1045_v26, %v1044_v17  ;;  %v929_v18 = vmul.f32 %v1795_v30, %v928_v47 }
 0x2dd   :  { %1659 = vmatmul.msk.bf16.gmra.mxu2 %vm81_vm0, %v1056_v44  ;;  %v933_v15 = vsel %vm932_vm7, %v1795_v30, %v929_v18 }
 0x2de   :  { %v1012_v23 = vmul.f32 %v933_v15, %v2600_v27 }
 0x2e0   :  { %v1029_v31 = vmul.f32 %v2685_v59, %v1012_v23 }
 0x2e2   :  { %v1046_v63 = vadd.f32 %v2698_v10, %v1029_v31 }
 0x2e3   :  { %1194 = vmatpush.bf16.xpose.msra.mxu3 %v1164_v54 }
 0x2ea   :  { %1665 = vmatmul.msk.bf16.vlgmr.msra.gmra.mxu3 %vm81_vm0, %v175_v45 }
 0x2ed   :  { %1660 = vmatmul.msk.bf16.gmra.mxu2 %vm81_vm0, %v1057_v46 }
 0x329   :  { %v793_v11 = vpop.xlane.xlu2 %792 }
 0x32a   :  { %v799_v13 = vpop.xlane.xlu0 %798  ;;  %v821_v32 = vmul.f32 %v793_v11, %v1992_v34 }
 0x32b   :  { %v823_v38 = vmul.f32 %v799_v13, %v1992_v34 }
 0x32c   :  { %v837_v51 = vadd.f32 1e-05, %v821_v32 }
 0x32d   :  { %v839_v19 = vadd.f32 1e-05, %v823_v38 }
 0x32e   :  { %1796 = vrsqrt.f32 %v837_v51  ;;  %vm940_vm8 = vweird.f32 %v837_v51 }
 0x32f   :  { %1798 = vrsqrt.f32 %v839_v19  ;;  %vm960_vm13 = vweird.f32 %v839_v19 }
 0x331   :  { %v796_v50 = vpop.xlane.xlu2 %795 }
 0x332   :  { %v802_v0 = vpop.xlane.xlu1 %801  ;;  %v822_v8 = vmul.f32 %v796_v50, %v1992_v34 }
 0x333   :  { %v824_v3 = vmul.f32 %v802_v0, %v1992_v34 }
 0x334   :  { %v1797_v56 = vpop.eup %1796  ;;  %v838_v62 = vadd.f32 1e-05, %v822_v8 }
 0x335   :  { %v2861_v41 = vpop.eup %1798  ;;  %v935_v16 = vmul.f32 %v1797_v56, %v837_v51  ;;  %v2864_v37 = vadd.f32 1e-05, %v824_v3  ;;  %vm941_vm9 = vweird.f32 %v1797_v56 }
 0x336   :  { %v955_v1 = vmul.f32 %v2861_v41, %v839_v19  ;;  %1800 = vrsqrt.f32 %v838_v62  ;;  %vm942_vm10 = vmor %vm940_vm8, %vm941_vm9  ;;  %vm950_vm11 = vweird.f32 %v838_v62  ;;  %vm961_vm14 = vweird.f32 %v2861_v41 }
 0x337   :  { %v936_v49 = vmul.f32 %v1797_v56, %v935_v16  ;;  %1802 = vrsqrt.f32 %v2864_v37  ;;  %vm2884_vm1 = vmor %vm960_vm13, %vm961_vm14  ;;  %vm970_vm4 = vweird.f32 %v2864_v37 }
 0x338   :  { %v956_v24 = vmul.f32 %v2861_v41, %v955_v1 }
 0x339   :  { %v937_v33 = vmul.f32 0.5, %v936_v49  ;;  %v805_v40 = vpop.xlane.xlu2 %804 }
 0x33a   :  { %v825_v22 = vmul.f32 %v805_v40, %v1992_v34  ;;  %v957_v9 = vmul.f32 0.5, %v956_v24 }
 0x33b   :  { %v938_v21 = vsub.f32 1.5, %v937_v33 }
 0x33c   :  { %v1801_v25 = vpop.eup %1800  ;;  %v841_v55 = vadd.f32 1e-05, %v825_v22  ;;  %v958_v48 = vsub.f32 1.5, %v957_v9 }
 0x33d   :  { %v939_v28 = vmul.f32 %v1797_v56, %v938_v21  ;;  %v945_v35 = vmul.f32 %v1801_v25, %v838_v62  ;;  %v2872_v54 = vpop.eup %1802  ;;  %vm951_vm12 = vweird.f32 %v1801_v25 }
 0x33e   :  { %1804 = vrsqrt.f32 %v841_v55  ;;  %v959_v17 = vmul.f32 %v2861_v41, %v958_v48  ;;  %v965_v46 = vmul.f32 %v2872_v54, %v2864_v37  ;;  %vm952_vm15 = vmor %vm950_vm11, %vm951_vm12  ;;  %vm980_vm2 = vweird.f32 %v841_v55 }
 0x33f   :  { %v943_v53 = vsel %vm942_vm10, %v1797_v56, %v939_v28  ;;  %v946_v44 = vmul.f32 %v1801_v25, %v945_v35  ;;  %vm971_vm5 = vweird.f32 %v2872_v54 }
 0x340   :  { %v1013_v4 = vmul.f32 %v943_v53, %v2666_v61  ;;  %v2874_v14 = vpop.f32.mrf.mxu2  ;;  %v963_v32 = vsel %vm2884_vm1, %v2861_v41, %v959_v17  ;;  %v966_v38 = vmul.f32 %v2872_v54, %v965_v46  ;;  %vm972_vm7 = vmor %vm970_vm4, %vm971_vm5 }
 0x341   :  { %v808_v42 = vpop.xlane.xlu0 %807  ;;  %v947_v27 = vmul.f32 0.5, %v946_v44  ;;  %v1015_v8 = vmul.f32 %v963_v32, %v2669_v39 }
 0x342   :  { %v1030_v5 = vmul.f32 %v2685_v59, %v1013_v4  ;;  %v826_v61 = vmul.f32 %v808_v42, %v1992_v34  ;;  %v967_v18 = vmul.f32 0.5, %v966_v38 }
 0x343   :  { %v948_v57 = vsub.f32 1.5, %v947_v27  ;;  %v1032_v16 = vmul.f32 %v2685_v59, %v1015_v8 }
 0x344   :  { %v1047_v45 = vadd.f32 %v2698_v10, %v1030_v5  ;;  %v1805_v26 = vpop.eup %1804  ;;  %v842_v13 = vadd.f32 1e-05, %v826_v61 }
 0x345   :  { %v949_v7 = vmul.f32 %v1801_v25, %v948_v57  ;;  %v975_v30 = vmul.f32 %v1805_v26, %v841_v55  ;;  %vm981_vm3 = vweird.f32 %v1805_v26  ;;  %v1049_v24 = vadd.f32 %v2698_v10, %v1032_v16 }
 0x346   :  { %v1058_v60 = vpack.c.bf16 %v1047_v45, %v1046_v63  ;;  %1806 = vrsqrt.f32 %v842_v13  ;;  %vm982_vm6 = vmor %vm980_vm2, %vm981_vm3  ;;  %vm990_vm10 = vweird.f32 %v842_v13  ;;  %v1204_v57 = vlaneseq }
 0x347   :  { %v953_v58 = vsel %vm952_vm15, %v1801_v25, %v949_v7  ;;  %v976_v11 = vmul.f32 %v1805_v26, %v975_v30 }
 0x348   :  { %1661 = vmatmul.msk.bf16.gmra.mxu2 %vm81_vm0, %v1058_v60  ;;  %v1014_v51 = vmul.f32 %v953_v58, %v2713_v6  ;;  %v2894_v19 = vpop.f32.mrf.mxu2  ;;  %v968_v6 = vsub.f32 1.5, %v967_v18 }
 0x349   :  { %v811_v2 = vpop.xlane.xlu1 %810  ;;  %v977_v50 = vmul.f32 0.5, %v976_v11  ;;  %v1152_v0 = vpack.c.bf16 %v2894_v19, %v2874_v14  ;;  %v1728_v14 = vld [vmem:[%s3045_s5 + $0x30] sm:$0xff] }
 0x34a   :  { %v827_v47 = vmul.f32 %v811_v2, %v1992_v34  ;;  %v1031_v3 = vmul.f32 %v2685_v59, %v1014_v51  ;;  %v969_v33 = vmul.f32 %v2872_v54, %v968_v6 }
 0x34b   :  { %v978_v41 = vsub.f32 1.5, %v977_v50 }
 0x34c   :  { %v843_v56 = vadd.f32 1e-05, %v827_v47  ;;  %v1807_v62 = vpop.eup %1806  ;;  %v1048_v49 = vadd.f32 %v2698_v10, %v1031_v3  ;;  %v973_v9 = vsel %vm972_vm7, %v2872_v54, %v969_v33 }
 0x34d   :  { %v979_v39 = vmul.f32 %v1805_v26, %v978_v41  ;;  %v985_v40 = vmul.f32 %v1807_v62, %v842_v13  ;;  %v1016_v4 = vmul.f32 %v973_v9, %v2721_v12  ;;  %vm991_vm11 = vweird.f32 %v1807_v62  ;;  %v1729_v9 = vld [vmem:[%s3045_s5 + $0x38] sm:$0xff] }
 0x34e   :  { %1808 = vrsqrt.f32 %v843_v56  ;;  %v1059_v22 = vpack.c.bf16 %v1049_v24, %v1048_v49  ;;  %vm1000_vm8 = vweird.f32 %v843_v56  ;;  %vm992_vm13 = vmor %vm990_vm10, %vm991_vm11 }
 0x34f   :  { %v983_v23 = vsel %vm982_vm6, %v1805_v26, %v979_v39  ;;  %v986_v37 = vmul.f32 %v1807_v62, %v985_v40  ;;  %v1033_v42 = vmul.f32 %v2685_v59, %v1016_v4  ;;  %v1205_v26 = vand.u32 127, %v1204_v57 }
 0x350   :  { %v2902_v1 = vpop.f32.mrf.mxu2  ;;  %v1017_v28 = vmul.f32 %v983_v23, %v2756_v20 }
 0x351   :  { %v987_v44 = vmul.f32 0.5, %v986_v37  ;;  %v1050_v12 = vadd.f32 %v2698_v10, %v1033_v42  ;;  %vm1215_vm14 = vcmp.lt.s32.totalorder %v1205_v26, 64  ;;  %vm1224_vm15 = vcmp.ge.s32.totalorder %v1205_v26, 64 }
 0x352   :  { %v1034_v31 = vmul.f32 %v2685_v59, %v1017_v28 }
 0x353   :  { %v988_v27 = vsub.f32 1.5, %v987_v44 }
 0x354   :  { %v1809_v15 = vpop.eup %1808  ;;  %v1051_v20 = vadd.f32 %v2698_v10, %v1034_v31 }
 0x355   :  { %v995_v21 = vmul.f32 %v1809_v15, %v843_v56  ;;  %vm1001_vm9 = vweird.f32 %v1809_v15  ;;  %v989_v61 = vmul.f32 %v1807_v62, %v988_v27 }
 0x356   :  { %vm1002_vm12 = vmor %vm1000_vm8, %vm1001_vm9  ;;  %v1060_v63 = vpack.c.bf16 %v1051_v20, %v1050_v12 }
 0x357   :  { %v996_v25 = vmul.f32 %v1809_v15, %v995_v21  ;;  %v993_v17 = vsel %vm992_vm13, %v1807_v62, %v989_v61  ;;  %v1850_v61 = vld [vmem:[%s3040_s0 + $0x8] sm:$0xff] }
 0x358   :  { %1662 = vmatmul.msk.bf16.gmra.mxu2 %vm81_vm0, %v1059_v22  ;;  %v2912_v55 = vpop.f32.mrf.mxu2  ;;  %v1018_v30 = vmul.f32 %v993_v17, %v2781_v52 }
 0x359   :  { %v997_v35 = vmul.f32 0.5, %v996_v25  ;;  %v1153_v53 = vpack.c.bf16 %v2912_v55, %v2902_v1  ;;  %v2948_v55 = vld [vmem:[%s3044_s4 + $0x8] sm:$0x1f] }
 0x35a   :  { %v1035_v13 = vmul.f32 %v2685_v59, %v1018_v30 }
 0x35b   :  { %v998_v48 = vsub.f32 1.5, %v997_v35 }
 0x35c   :  { %v1052_v38 = vadd.f32 %v2698_v10, %v1035_v13 }
 0x35d   :  { %v999_v5 = vmul.f32 %v1809_v15, %v998_v48 }
 0x35f   :  { %v1003_v45 = vsel %vm1002_vm12, %v1809_v15, %v999_v5 }
 0x360   :  { %v2919_v54 = vpop.f32.mrf.mxu2  ;;  %v1019_v46 = vmul.f32 %v1003_v45, %v2822_v29 }
 0x362   :  { %v1036_v11 = vmul.f32 %v2685_v59, %v1019_v46 }
 0x364   :  { %v1053_v32 = vadd.f32 %v2698_v10, %v1036_v11 }
 0x366   :  { %v1061_v51 = vpack.c.bf16 %v1053_v32, %v1052_v38 }
 0x368   :  { %1663 = vmatmul.msk.bf16.gmra.mxu2 %vm81_vm0, %v1060_v63  ;;  %v1124_v43 = vpop.f32.mrf.mxu2 }
 0x369   :  { %v1154_v7 = vpack.c.bf16 %v1124_v43, %v2919_v54  ;;  %v1849_v54 = vld [vmem:[%s3040_s0] sm:$0xff] }
 0x36d   :  { %v1196_v60 = vpop.f32.mrf.mxu3 }
 0x36e   :  { %v1232_v58 = vsel %vm1215_vm14, %v1196_v60, -1e+09 }
 0x36f   :  { %1234 = vmax.xlane.f32.xlu2 %v1232_v58 }
 0x370   :  { %v1127_v47 = vpop.f32.mrf.mxu2 }
 0x375   :  { %v1198_v2 = vpop.f32.mrf.mxu3 }
 0x376   :  { %v1233_v29 = vsel %vm1224_vm15, %v1198_v2, -1e+09  ;;  %v1731_v2 = vld [vmem:[%s3045_s5 + $0x48] sm:$0xff] }
 0x377   :  { %1236 = vmax.xlane.f32.xlu0 %v1233_v29 }
 0x378   :  { %1664 = vmatmul.msk.bf16.gmra.mxu2 %vm81_vm0, %v1061_v51  ;;  %v1129_v52 = vpop.f32.mrf.mxu2  ;;  %v1730_v51 = vld [vmem:[%s3045_s5 + $0x40] sm:$0xff] }
 0x379   :  { %v1155_v25 = vpack.c.bf16 %v1129_v52, %v1127_v47 }
 0x3cb   :  { %v1132_v50 = vpop.f32.mrf.mxu2 }
 0x3d3   :  { %v1134_v8 = vpop.f32.mrf.mxu2 }
 0x3d4   :  { %v1156_v23 = vpack.c.bf16 %v1134_v8, %v1132_v50 }
 0x3db   :  { %v1137_v56 = vpop.f32.mrf.mxu2 }
 0x3e2   :  { %v1235_v18 = vpop.xlane.xlu2 %1234 }
 0x3e3   :  { %v1238_v3 = vsub.f32 %v1232_v58, %v1235_v18  ;;  %v1139_v41 = vpop.f32.mrf.mxu2 }
 0x3e4   :  { %v1157_v22 = vpack.c.bf16 %v1139_v41, %v1137_v56 }
 0x3e5   :  { %v1240_v59 = vmul.f32 1.442695, %v1238_v3 }
 0x3e7   :  { %1810 = vpow2.f32 %v1240_v59 }
 0x3ea   :  { %v1237_v16 = vpop.xlane.xlu0 %1236 }
 0x3eb   :  { %v1239_v6 = vsub.f32 %v1233_v29, %v1237_v16  ;;  %v1142_v62 = vpop.f32.mrf.mxu2 }
 0x3ed   :  { %v1811_v10 = vpop.eup %1810  ;;  %v1242_v49 = vmul.f32 1.442695, %v1239_v6 }
 0x3ee   :  { %1244 = vadd.xlane.f32.xlu1 %v1811_v10 }
 0x3ef   :  { %1812 = vpow2.f32 %v1242_v49 }
 0x3f3   :  { %v1144_v39 = vpop.f32.mrf.mxu2 }
 0x3f4   :  { %v1158_v21 = vpack.c.bf16 %v1144_v39, %v1142_v62 }
 0x3f5   :  { %v1813_v15 = vpop.eup %1812 }
 0x3f6   :  { %1246 = vadd.xlane.f32.xlu2 %v1813_v15 }
 0x3fb   :  { %v1147_v24 = vpop.f32.mrf.mxu2 }
 0x403   :  { %v1149_v33 = vpop.f32.mrf.mxu2 }
 0x404   :  { %v1159_v40 = vpack.c.bf16 %v1149_v33, %v1147_v24 }
 0x406   :  { %1253 = vmatpush.bf16.msrb.mxu0 %v1159_v40 }
 0x40a   :  { %1254 = vmatpush.bf16.msrb.mxu0 %v1158_v21  ;;  %v1352_v21 = vperm.slane %v2948_v55, 0 }
 0x40e   :  { %1255 = vmatpush.bf16.msrb.mxu0 %v1157_v22 }
 0x412   :  { %1256 = vmatpush.bf16.msrb.mxu0 %v1156_v23 }
 0x416   :  { %1257 = vmatpush.bf16.msrb.mxu0 %v1155_v25 }
 0x41a   :  { %1258 = vmatpush.bf16.msrb.mxu0 %v1154_v7 }
 0x41e   :  { %1259 = vmatpush.bf16.msrb.mxu0 %v1153_v53  ;;  %v1273_v53 = vperm.slane %v2948_v55, 2 }
 0x422   :  { %1260 = vmatpush.bf16.msrb.mxu0 %v1152_v0 }
 0x426   :  { %1295 = vmatpush.bf16.msra.mxu0 %v1729_v9 }
 0x42a   :  { %1296 = vmatpush.bf16.msra.mxu0 %v1728_v14 }
 0x461   :  { %v1245_v37 = vpop.xlane.xlu1 %1244 }
 0x462   :  { %1814 = vrcp.f32 %v1245_v37 }
 0x468   :  { %v1815_v35 = vpop.eup %1814 }
 0x469   :  { %v1247_v28 = vpop.xlane.xlu2 %1246  ;;  %v1250_v44 = vmul.f32 %v1815_v35, %v1811_v10 }
 0x46a   :  { %1816 = vrcp.f32 %v1247_v28 }
 0x470   :  { %v1817_v4 = vpop.eup %1816 }
 0x471   :  { %v1251_v31 = vmul.f32 %v1817_v4, %v1813_v15  ;;  %v1349_v15 = vperm.slane %v2682_v36, 3 }
 0x473   :  { %v1252_v48 = vpack.c.bf16 %v1251_v31, %v1250_v44 }
 0x475   :  { %1261 = vmatmul.bf16.vlgmr.msrb.gmra.mxu0 %v1252_v48 }
 0x476   :  { %1382 = vmatpush.bf16.msrb.mxu0 %v1731_v2 }
 0x47a   :  { %1383 = vmatpush.bf16.msrb.mxu0 %v1730_v51 }
 0x4f2   :  { %v1262_v19 = vpop.f32.mrf.mxu0 }
 0x4fa   :  { %v1264_v0 = vpop.f32.mrf.mxu0 }
 0x4fb   :  { %v1267_v1 = vpack.c.bf16 %v1264_v0, %v1262_v19 }
 0x4fd   :  { %1678 = vmatmul.msk.bf16.vlgmr.msra.gmra.mxu0 %vm81_vm0, %v1267_v1 }
 0x57a   :  { %v1298_v42 = vpop.f32.mrf.mxu0 }
 0x57b   :  { %v1299_v27 = vadd.f32 %v1298_v42, %v1273_v53 }
 0x57d   :  { %v2954_v20 = vadd.f32 %v1849_v54, %v1299_v27 }
 0x57f   :  { %v1305_v5 = vsel %vm81_vm0, %v2954_v20, 0.0 }
 0x580   :  { %1306 = vadd.xlane.f32.xlu0 %v1305_v5 }
 0x582   :  { %v1300_v57 = vpop.f32.mrf.mxu0 }
 0x583   :  { %v1301_v12 = vadd.f32 %v1300_v57, %v1273_v53 }
 0x585   :  { %v1304_v63 = vadd.f32 %v1850_v61, %v1301_v12  ;;  %v1733_v12 = vld [vmem:[%s3045_s5 + $0x58] sm:$0xff] }
 0x586   :  { %1470 = vmatpush.bf16.msrb.mxu3 %v1733_v12 }
 0x587   :  { %v1308_v45 = vsel %vm81_vm0, %v1304_v63, 0.0 }
 0x588   :  { %1309 = vadd.xlane.f32.xlu1 %v1308_v45  ;;  %v1732_v45 = vld [vmem:[%s3045_s5 + $0x50] sm:$0xff] }
 0x58a   :  { %1471 = vmatpush.bf16.msrb.mxu3 %v1732_v45 }
 0x5f3   :  { %v1307_v26 = vpop.xlane.xlu0 %1306 }
 0x5f4   :  { %v1311_v17 = vmul.f32 %v1307_v26, %v1992_v34 }
 0x5f6   :  { %v1313_v46 = vsub.f32 %v2954_v20, %v1311_v17 }
 0x5f8   :  { %v1315_v43 = vmul.f32 %v1313_v46, %v1313_v46 }
 0x5fa   :  { %v1317_v7 = vsel %vm81_vm0, %v1315_v43, 0.0 }
 0x5fb   :  { %v1310_v30 = vpop.xlane.xlu1 %1309  ;;  %1318 = vadd.xlane.f32.xlu2 %v1317_v7 }
 0x5fc   :  { %v1312_v60 = vmul.f32 %v1310_v30, %v1992_v34 }
 0x5fe   :  { %v1314_v58 = vsub.f32 %v1304_v63, %v1312_v60 }
 0x600   :  { %v1316_v11 = vmul.f32 %v1314_v58, %v1314_v58 }
 0x602   :  { %v1320_v13 = vsel %vm81_vm0, %v1316_v11, 0.0 }
 0x603   :  { %1321 = vadd.xlane.f32.xlu0 %v1320_v13 }
 0x66e   :  { %v1319_v32 = vpop.xlane.xlu2 %1318 }
 0x66f   :  { %v1323_v38 = vmul.f32 %v1319_v32, %v1992_v34 }
 0x671   :  { %v1325_v29 = vadd.f32 1e-05, %v1323_v38 }
 0x673   :  { %1818 = vrsqrt.f32 %v1325_v29  ;;  %vm1333_vm2 = vweird.f32 %v1325_v29 }
 0x676   :  { %v1322_v47 = vpop.xlane.xlu0 %1321 }
 0x677   :  { %v1324_v52 = vmul.f32 %v1322_v47, %v1992_v34 }
 0x679   :  { %v1819_v50 = vpop.eup %1818  ;;  %v1326_v8 = vadd.f32 1e-05, %v1324_v52 }
 0x67a   :  { %v1328_v56 = vmul.f32 %v1819_v50, %v1325_v29  ;;  %vm1334_vm1 = vweird.f32 %v1819_v50 }
 0x67b   :  { %1820 = vrsqrt.f32 %v1326_v8  ;;  %vm1335_vm3 = vmor %vm1333_vm2, %vm1334_vm1  ;;  %vm1343_vm5 = vweird.f32 %v1326_v8 }
 0x67c   :  { %v1329_v18 = vmul.f32 %v1819_v50, %v1328_v56 }
 0x67e   :  { %v1330_v3 = vmul.f32 0.5, %v1329_v18 }
 0x680   :  { %v1331_v41 = vsub.f32 1.5, %v1330_v3  ;;  %v1439_v3 = vperm.slane %v2948_v55, 1 }
 0x681   :  { %v1821_v59 = vpop.eup %1820 }
 0x682   :  { %v1332_v16 = vmul.f32 %v1819_v50, %v1331_v41  ;;  %v1338_v6 = vmul.f32 %v1821_v59, %v1326_v8  ;;  %vm1344_vm4 = vweird.f32 %v1821_v59 }
 0x683   :  { %vm1345_vm6 = vmor %vm1343_vm5, %vm1344_vm4 }
 0x684   :  { %v1339_v62 = vmul.f32 %v1821_v59, %v1338_v6  ;;  %v1336_v10 = vsel %vm1335_vm3, %v1819_v50, %v1332_v16 }
 0x685   :  { %v1347_v24 = vmul.f32 %v1336_v10, %v1313_v46 }
 0x686   :  { %v1340_v49 = vmul.f32 0.5, %v1339_v62  ;;  %v1448_v62 = vperm.slane %v2948_v55, 3 }
 0x687   :  { %v1350_v22 = vmul.f32 %v1349_v15, %v1347_v24 }
 0x688   :  { %v1341_v39 = vsub.f32 1.5, %v1340_v49 }
 0x689   :  { %v1353_v9 = vadd.f32 %v1352_v21, %v1350_v22 }
 0x68a   :  { %v1342_v33 = vmul.f32 %v1821_v59, %v1341_v39 }
 0x68c   :  { %v1346_v40 = vsel %vm1345_vm6, %v1821_v59, %v1342_v33 }
 0x68d   :  { %v1348_v23 = vmul.f32 %v1346_v40, %v1314_v58 }
 0x68f   :  { %v1351_v25 = vmul.f32 %v1349_v15, %v1348_v23 }
 0x691   :  { %v1354_v37 = vadd.f32 %v1352_v21, %v1351_v25 }
 0x693   :  { %v1355_v28 = vpack.c.bf16 %v1354_v37, %v1353_v9 }
 0x695   :  { %1691 = vmatmul.msk.bf16.vlgmr.msrb.gmra.mxu0 %vm81_vm0, %v1355_v28 }
 0x712   :  { %v1385_v35 = vpop.f32.mrf.mxu0 }
 0x713   :  { %v2979_v4 = vadd.f32 %v1385_v35, %v2954_v20 }
 0x715   :  { %v1392_v44 = vsel %vm81_vm0, %v2979_v4, 0.0 }
 0x716   :  { %1393 = vadd.xlane.f32.xlu1 %v1392_v44 }
 0x71a   :  { %v1387_v31 = vpop.f32.mrf.mxu0 }
 0x71b   :  { %v2983_v48 = vadd.f32 %v1387_v31, %v1304_v63 }
 0x71d   :  { %v1395_v14 = vsel %vm81_vm0, %v2983_v48, 0.0 }
 0x71e   :  { %1396 = vadd.xlane.f32.xlu2 %v1395_v14 }
 0x789   :  { %v1394_v19 = vpop.xlane.xlu1 %1393 }
 0x78a   :  { %v1398_v0 = vmul.f32 %v1394_v19, %v1992_v34 }
 0x78c   :  { %v1400_v1 = vsub.f32 %v2979_v4, %v1398_v0 }
 0x78e   :  { %v1402_v53 = vmul.f32 %v1400_v1, %v1400_v1 }
 0x790   :  { %v1404_v42 = vsel %vm81_vm0, %v1402_v53, 0.0 }
 0x791   :  { %1405 = vadd.xlane.f32.xlu0 %v1404_v42  ;;  %v1397_v27 = vpop.xlane.xlu2 %1396 }
 0x792   :  { %v1399_v54 = vmul.f32 %v1397_v27, %v1992_v34 }
 0x794   :  { %v1401_v20 = vsub.f32 %v2983_v48, %v1399_v54 }
 0x796   :  { %v1403_v5 = vmul.f32 %v1401_v20, %v1401_v20 }
 0x798   :  { %v1407_v57 = vsel %vm81_vm0, %v1403_v5, 0.0  ;;  %v1735_v5 = vld [vmem:[%s3045_s5 + $0x68] sm:$0xff] }
 0x799   :  { %1408 = vadd.xlane.f32.xlu1 %v1407_v57  ;;  %1586 = vmatpush.bf16.msra.mxu0 %v1735_v5 }
 0x804   :  { %v1406_v61 = vpop.xlane.xlu0 %1405 }
 0x805   :  { %v1410_v63 = vmul.f32 %v1406_v61, %v1992_v34 }
 0x807   :  { %v1412_v26 = vadd.f32 1e-05, %v1410_v63 }
 0x809   :  { %1822 = vrsqrt.f32 %v1412_v26  ;;  %vm1420_vm8 = vweird.f32 %v1412_v26 }
 0x80c   :  { %v1409_v17 = vpop.xlane.xlu1 %1408 }
 0x80d   :  { %v1411_v46 = vmul.f32 %v1409_v17, %v1992_v34  ;;  %v1436_v34 = vperm.slane %v2682_v36, 4 }
 0x80f   :  { %v1823_v43 = vpop.eup %1822  ;;  %v1413_v7 = vadd.f32 1e-05, %v1411_v46  ;;  %v1734_v46 = vld [vmem:[%s3045_s5 + $0x60] sm:$0xff]  ;;  %s1878_s5 = smov [#allocation2]  }
 0x810   :  { %v1415_v30 = vmul.f32 %v1823_v43, %v1412_v26  ;;  %vm1421_vm7 = vweird.f32 %v1823_v43  ;;  %1587 = vmatpush.bf16.msra.mxu0 %v1734_v46  ;;  %s1602_s30 = sshll.u32 %s1878_s5, 4  ;;  %s1603_s30 = int_to_ptr.vmem [resolvable:$true] %s1602_s30 }
 0x811   :  { %1824 = vrsqrt.f32 %v1413_v7  ;;  %vm1422_vm9 = vmor %vm1420_vm8, %vm1421_vm7  ;;  %vm1430_vm11 = vweird.f32 %v1413_v7 }
 0x812   :  { %v1416_v60 = vmul.f32 %v1823_v43, %v1415_v30 }
 0x814   :  { %v1417_v58 = vmul.f32 0.5, %v1416_v60 }
 0x816   :  { %v1418_v11 = vsub.f32 1.5, %v1417_v58 }
 0x817   :  { %v1825_v13 = vpop.eup %1824 }
 0x818   :  { %v1419_v32 = vmul.f32 %v1823_v43, %v1418_v11  ;;  %v1425_v38 = vmul.f32 %v1825_v13, %v1413_v7  ;;  %vm1431_vm10 = vweird.f32 %v1825_v13 }
 0x819   :  { %vm1432_vm12 = vmor %vm1430_vm11, %vm1431_vm10 }
 0x81a   :  { %v1426_v2 = vmul.f32 %v1825_v13, %v1425_v38  ;;  %v1423_v29 = vsel %vm1422_vm9, %v1823_v43, %v1419_v32 }
 0x81b   :  { %v1434_v52 = vmul.f32 %v1423_v29, %v1400_v1 }
 0x81c   :  { %v1427_v51 = vmul.f32 0.5, %v1426_v2 }
 0x81d   :  { %v1437_v18 = vmul.f32 %v1436_v34, %v1434_v52 }
 0x81e   :  { %v1428_v47 = vsub.f32 1.5, %v1427_v51 }
 0x81f   :  { %v1440_v59 = vadd.f32 %v1439_v3, %v1437_v18 }
 0x820   :  { %v1429_v50 = vmul.f32 %v1825_v13, %v1428_v47 }
 0x822   :  { %v1433_v8 = vsel %vm1432_vm12, %v1825_v13, %v1429_v50 }
 0x823   :  { %v1435_v56 = vmul.f32 %v1433_v8, %v1401_v20 }
 0x825   :  { %v1438_v41 = vmul.f32 %v1436_v34, %v1435_v56 }
 0x827   :  { %v1441_v16 = vadd.f32 %v1439_v3, %v1438_v41 }
 0x829   :  { %v1442_v6 = vpack.c.bf16 %v1441_v16, %v1440_v59 }
 0x82b   :  { %1704 = vmatmul.msk.bf16.vlgmr.msrb.gmra.mxu3 %vm81_vm0, %v1442_v6 }
 0x8ae   :  { %v1473_v10 = vpop.f32.mrf.mxu3 }
 0x8af   :  { %v3005_v49 = vadd.f32 %v1473_v10, %v1448_v62 }
 0x8b1   :  { %v3008_v36 = vmul.f32 0.70710677, %v3005_v49 }
 0x8b3   :  { %v1482_v39 = vand.u32 2147483647, %v3008_v36  ;;  %v1536_v42 = vsub.f32 0.0, %v3008_v36  ;;  %vm1548_vm6 = vcmp.lt.f32.partialorder %v3008_v36, 0.0 }
 0x8b5   :  { %v1484_v15 = vmul.f32 0.3275911, %v1482_v39  ;;  %v1538_v61 = vmul.f32 %v1536_v42, %v3008_v36 }
 0x8b6   :  { %v1475_v24 = vpop.f32.mrf.mxu3 }
 0x8b7   :  { %v1486_v33 = vadd.f32 1.0, %v1484_v15  ;;  %v3011_v40 = vadd.f32 %v1475_v24, %v1448_v62  ;;  %v1540_v30 = vmul.f32 1.442695, %v1538_v61 }
 0x8b9   :  { %1826 = vrcp.f32 %v1486_v33  ;;  %v3014_v21 = vmul.f32 0.70710677, %v3011_v40  ;;  %v1499_v35 = vand.u32 2147483648, %v1486_v33  ;;  %v1497_v31 = vand.u32 2147483647, %v1486_v33 }
 0x8ba   :  { %vm1493_vm14 = vweird.f32 %v1486_v33 }
 0x8bb   :  { %v1483_v22 = vand.u32 2147483647, %v3014_v21  ;;  %v1500_v19 = vor.u32 1.1754944e-38, %v1499_v35  ;;  %vm1498_vm1 = vcmp.eq.f32.partialorder %v1497_v31, 8.507059e+37  ;;  %v1537_v13 = vsub.f32 0.0, %v3014_v21 }
 0x8bc   :  { %vm1549_vm7 = vcmp.lt.f32.partialorder %v3014_v21, 0.0 }
 0x8bd   :  { %v1485_v23 = vmul.f32 0.3275911, %v1483_v22  ;;  %v1539_v51 = vmul.f32 %v1537_v13, %v3014_v21 }
 0x8bf   :  { %v1827_v25 = vpop.eup %1826  ;;  %v1487_v37 = vadd.f32 1.0, %v1485_v23  ;;  %v1542_v8 = vmul.f32 1.442695, %v1539_v51 }
 0x8c0   :  { %v1489_v9 = vmul.f32 %v1827_v25, %v1486_v33  ;;  %vm1494_vm13 = vweird.f32 %v1827_v25 }
 0x8c1   :  { %1828 = vrcp.f32 %v1487_v37  ;;  %vm1495_vm15 = vmor %vm1493_vm14, %vm1494_vm13  ;;  %v1514_v12 = vand.u32 2147483648, %v1487_v37  ;;  %v1512_v45 = vand.u32 2147483647, %v1487_v37  ;;  %vm1508_vm3 = vweird.f32 %v1487_v37 }
 0x8c2   :  { %v1490_v28 = vsub.f32 1.0, %v1489_v9  ;;  %1830 = vpow2.f32 %v1540_v30  ;;  %v1478_v9 = vmul.f32 0.5, %v3005_v49 }
 0x8c3   :  { %v1515_v7 = vor.u32 1.1754944e-38, %v1514_v12  ;;  %vm1513_vm5 = vcmp.eq.f32.partialorder %v1512_v45, 8.507059e+37  ;;  %1832 = vpow2.f32 %v1542_v8 }
 0x8c4   :  { %v1491_v44 = vmul.f32 %v1827_v25, %v1490_v28 }
 0x8c6   :  { %v1492_v14 = vadd.f32 %v1827_v25, %v1491_v44 }
 0x8c7   :  { %v1829_v0 = vpop.eup %1828 }
 0x8c8   :  { %v1496_v1 = vsel %vm1495_vm15, %v1827_v25, %v1492_v14  ;;  %v1504_v27 = vmul.f32 %v1829_v0, %v1487_v37  ;;  %vm1509_vm2 = vweird.f32 %v1829_v0  ;;  %v1831_v56 = vpop.eup %1830  ;;  %v1479_v37 = vmul.f32 0.5, %v3011_v40 }
 0x8c9   :  { %v1501_v53 = vsel %vm1498_vm1, %v1500_v19, %v1496_v1  ;;  %vm1510_vm4 = vmor %vm1508_vm3, %vm1509_vm2  ;;  %v1833_v39 = vpop.eup %1832  ;;  %v1564_v14 = vperm.slane %v2948_v55, 4 }
 0x8ca   :  { %v1518_v54 = vmul.f32 1.0614054, %v1501_v53  ;;  %v1505_v20 = vsub.f32 1.0, %v1504_v27 }
 0x8cc   :  { %v1705_v57 = vadd.f32 -1.4531521, %v1518_v54  ;;  %v1506_v63 = vmul.f32 %v1829_v0, %v1505_v20 }
 0x8ce   :  { %v1522_v26 = vmul.f32 %v1705_v57, %v1501_v53  ;;  %v1507_v17 = vadd.f32 %v1829_v0, %v1506_v63 }
 0x8d0   :  { %v1524_v43 = vadd.f32 1.4214138, %v1522_v26  ;;  %v1511_v60 = vsel %vm1510_vm4, %v1829_v0, %v1507_v17 }
 0x8d1   :  { %v1516_v11 = vsel %vm1513_vm5, %v1515_v7, %v1511_v60 }
 0x8d2   :  { %v1526_v58 = vmul.f32 %v1524_v43, %v1501_v53  ;;  %v1519_v32 = vmul.f32 1.0614054, %v1516_v11 }
 0x8d4   :  { %v1707_v38 = vadd.f32 -0.28449672, %v1526_v58  ;;  %v1706_v2 = vadd.f32 -1.4531521, %v1519_v32 }
 0x8d6   :  { %v1530_v29 = vmul.f32 %v1707_v38, %v1501_v53  ;;  %v1523_v47 = vmul.f32 %v1706_v2, %v1516_v11 }
 0x8d8   :  { %v1532_v52 = vadd.f32 0.2548296, %v1530_v29  ;;  %v1525_v34 = vadd.f32 1.4214138, %v1523_v47 }
 0x8da   :  { %v1534_v50 = vmul.f32 %v1532_v52, %v1501_v53  ;;  %v1527_v18 = vmul.f32 %v1525_v34, %v1516_v11 }
 0x8dc   :  { %v1544_v3 = vmul.f32 %v1831_v56, %v1534_v50  ;;  %v1708_v41 = vadd.f32 -0.28449672, %v1527_v18 }
 0x8de   :  { %v1546_v59 = vsub.f32 1.0, %v1544_v3  ;;  %v1531_v16 = vmul.f32 %v1708_v41, %v1516_v11 }
 0x8e0   :  { %v1533_v6 = vadd.f32 0.2548296, %v1531_v16  ;;  %v1550_v62 = vsub.f32 0.0, %v1546_v59 }
 0x8e2   :  { %v1535_v10 = vmul.f32 %v1533_v6, %v1516_v11  ;;  %v1552_v24 = vsel %vm1548_vm6, %v1550_v62, %v1546_v59 }
 0x8e3   :  { %v1554_v23 = vadd.f32 1.0, %v1552_v24 }
 0x8e4   :  { %v1545_v15 = vmul.f32 %v1833_v39, %v1535_v10 }
 0x8e5   :  { %v1556_v35 = vmul.f32 %v1554_v23, %v1478_v9 }
 0x8e6   :  { %v1547_v33 = vsub.f32 1.0, %v1545_v15 }
 0x8e8   :  { %v1551_v22 = vsub.f32 0.0, %v1547_v33 }
 0x8ea   :  { %v1553_v25 = vsel %vm1549_vm7, %v1551_v22, %v1547_v33 }
 0x8eb   :  { %v1555_v28 = vadd.f32 1.0, %v1553_v25 }
 0x8ed   :  { %v1557_v44 = vmul.f32 %v1555_v28, %v1479_v37 }
 0x8ef   :  { %v1558_v31 = vpack.c.bf16 %v1557_v44, %v1556_v35 }
 0x8f1   :  { %1721 = vmatmul.msk.bf16.vlgmr.msra.gmra.mxu0 %vm81_vm0, %v1558_v31 }
 0x96e   :  { %v1589_v36 = vpop.f32.mrf.mxu0 }
 0x96f   :  { %v1590_v19 = vadd.f32 %v1589_v36, %v1564_v14 }
 0x971   :  { %v1594_v0 = vadd.f32 %v1590_v19, %v2979_v4 }
 0x973   :  { %1596 = vst.msk [vmem:[#allocation2] sm:$0xff] %vm81_vm0, %v1594_v0 }
 0x976   :  { %v1591_v49 = vpop.f32.mrf.mxu0 }
 0x977   :  { %v1592_v40 = vadd.f32 %v1591_v49, %v1564_v14 }
 0x979   :  { %v1595_v21 = vadd.f32 %v1592_v40, %v2983_v48 }
 0x97b   :  { %1597 = vst.msk [vmem:[#allocation2 + $0x8] sm:$0xff] %vm81_vm0, %v1595_v21 }
 0x97c   :  { %1610 = dma.vmem_to_hbm [thread:$0]  %s1603_s30, 256, %s1605_s9, [#allocation3], %s1879_s10, %s1879_s10, %s1880_s11  }
 0x97d   :  { %1875 = dma.done.wait [#allocation3], 256  }
 0x97e   :  { %1876 = vsyncadd [#allocation3], 4294967040 }
 0x97f   :  { %1615 = vsyncpa [#allocation3], 1 }

</bundles_post_ra>
